<compile_context>
chip_gen: v5e
topology: v5e:2x2
jax: 0.10.0
libtpu: 0.0.40
codegen_flags: <defaults>
</compile_context>

<pallas_src>
import functools

import jax
import jax.numpy as jnp
from jax.experimental import pallas as pl
from jax.experimental.pallas import tpu as pltpu


# ----------------------------------------------------------------------------
# in-kernel helpers
# ----------------------------------------------------------------------------
def _layernorm(x, g, b, eps=1e-5):
    mu = jnp.mean(x, axis=-1, keepdims=True)
    xc = x - mu
    var = jnp.mean(xc * xc, axis=-1, keepdims=True)
    return xc * jax.lax.rsqrt(var + eps) * g + b


def _pad_seq(s):
    # Real CLIP text length 77 -> 128 (per-head score matmul = one MXU tile,
    # lane-dense stores, layout-clean (TB,S,D)->(TB*S,D) merge).  Tiny test
    # shapes only need sublane (8) alignment to keep compute small.
    target = 128 if s > 64 else 8
    return ((s + target - 1) // target) * target


def _pick_tb(batch, tb_max):
    tb = max(1, min(batch, tb_max))
    while batch % tb != 0:
        tb -= 1
    return tb


# ----------------------------------------------------------------------------
# fused transformer: all residual attention blocks in one pallas_call
# grid = (batch_blocks, layer); activation block resident across the layer axis
# ----------------------------------------------------------------------------
def _transformer_kernel(x_ref, pos_ref,
                        ln1g_ref, ln1b_ref, wqkv_ref, bqkv_ref, wo_ref, bo_ref,
                        ln2g_ref, ln2b_ref, wfc_ref, bfc_ref, wproj_ref, bproj_ref,
                        o_ref,
                        qkv_sc, ctx_sc,
                        *, n_heads):
    bf16 = jnp.bfloat16
    layer = pl.program_id(1)

    # layer 0: seed the resident activation block and fuse the pos-emb add.
    @pl.when(layer == 0)
    def _():
        o_ref[...] = x_ref[...] + pos_ref[...]

    TB, S, D = o_ref.shape
    hd = D // n_heads
    scale = 1.0 / (hd ** 0.5)

    # resident activation, flattened so every projection matmul has M = TB*S
    x = o_ref[...].reshape(TB * S, D)            # (TB*S, D) f32

    # causal mask built on the VPU (no (S, S) DMA per layer); also masks the
    # padded columns (col >= original S > row) for all real rows.
    rows = jax.lax.broadcasted_iota(jnp.int32, (S, S), 0)
    cols = jax.lax.broadcasted_iota(jnp.int32, (S, S), 1)
    mask = jnp.where(cols > rows, jnp.float32(-1e9), jnp.float32(0.0))

    # ---- pre-LN multi-head self-attention -----------------------------------
    h = _layernorm(x, ln1g_ref[0], ln1b_ref[0])
    qkv = jnp.dot(h.astype(bf16), wqkv_ref[0],
                  preferred_element_type=jnp.float32) + bqkv_ref[0]    # (TB*S, 3D)
    qkv_sc[...] = qkv.astype(bf16).reshape(TB, S, 3 * D)

    # Per-(sequence, head) attention.  q/k/v slabs are read from the VMEM
    # scratch ref (bounds live ranges of the static unroll) and each head's
    # context is stored at its lane offset in ctx_sc -> a single K=D output
    # projection afterwards (no per-head K=hd matmuls, no f32 accumulator adds).
    for b in range(TB):
        for hh in range(n_heads):
            lo = hh * hd
            q = qkv_sc[b, :, lo:lo + hd]                               # (S, hd) bf16
            k = qkv_sc[b, :, D + lo:D + lo + hd]
            v = qkv_sc[b, :, 2 * D + lo:2 * D + lo + hd]
            s = jax.lax.dot_general(q, k, (((1,), (1,)), ((), ())),
                                    preferred_element_type=jnp.float32)  # (S, S)
            s = s * scale + mask
            s = s - jnp.max(s, axis=-1, keepdims=True)
            p = jnp.exp(s)
            p = p * pl.reciprocal(jnp.sum(p, axis=-1, keepdims=True), approx=True)
            ctx = jnp.dot(p.astype(bf16), v,
                          preferred_element_type=jnp.float32)          # (S, hd)
            ctx_sc[b, :, lo:lo + hd] = ctx.astype(bf16)

    attn = jnp.dot(ctx_sc[...].reshape(TB * S, D), wo_ref[0],
                   preferred_element_type=jnp.float32) + bo_ref[0]     # (TB*S, D)
    x = x + attn

    # ---- pre-LN MLP with QuickGELU ------------------------------------------
    h2 = _layernorm(x, ln2g_ref[0], ln2b_ref[0])
    h2 = jnp.dot(h2.astype(bf16), wfc_ref[0],
                 preferred_element_type=jnp.float32) + bfc_ref[0]
    h2 = h2 * jax.nn.sigmoid(1.702 * h2)           # QuickGELU
    h2 = jnp.dot(h2.astype(bf16), wproj_ref[0],
                 preferred_element_type=jnp.float32) + bproj_ref[0]
    x = x + h2

    o_ref[...] = x.reshape(TB, S, D)


_LAYER_WEIGHT_NAMES = ('ln1_g', 'ln1_b', 'w_qkv', 'b_qkv', 'w_o', 'b_o',
                       'ln2_g', 'ln2_b', 'w_fc', 'b_fc', 'w_proj', 'b_proj')


def transformer_forward(x, pos, params, n_heads, tb_max=4):
    """All residual attention blocks in a single pipelined pallas_call.

    x:   (B, S_pad, D) f32 prompts (pos-emb NOT yet added; fused in-kernel)
    pos: (S_pad, D) f32 positional embedding
    """
    B, S, D = x.shape
    weights = [params[name] for name in _LAYER_WEIGHT_NAMES]
    L = params['w_qkv'].shape[0]
    # TB=4 is safe on every generation's VMEM budget (v7x 64 MiB); on v5e/v6e a
    # caller can pass tb_max=8 for more weight-DMA amortization.
    TB = _pick_tb(B, tb_max)

    in_specs = [
        # activation block: constant across the layer axis -> DMA'd once per
        # batch block; TB sequences share every layer's weight DMA.
        pl.BlockSpec((TB, S, D), lambda b, l: (b, 0, 0)),
        pl.BlockSpec((S, D), lambda b, l: (0, 0)),          # pos emb (resident)
    ]
    # Weight blocks follow the (innermost) layer grid axis, so layer l+1's bf16
    # weights are prefetched / double-buffered while layer l computes.
    in_specs += [pl.BlockSpec((1,) + w.shape[1:], lambda b, l: (l, 0, 0))
                 for w in weights]

    # generation-aware VMEM budget (v5e/v6e: ~96 MiB of 128; v7x: 48 of 64).
    try:
        vmem_cap = pltpu.get_tpu_info().vmem_capacity_bytes
    except Exception:
        vmem_cap = 64 << 20
    vmem_limit = min(int(vmem_cap * 3 // 4), 100 << 20)

    return pl.pallas_call(
        functools.partial(_transformer_kernel, n_heads=n_heads),
        grid=(B // TB, L),
        in_specs=in_specs,
        # Same block index across the layer axis -> activation resident in VMEM.
        out_specs=pl.BlockSpec((TB, S, D), lambda b, l: (b, 0, 0)),
        out_shape=jax.ShapeDtypeStruct((B, S, D), jnp.float32),
        scratch_shapes=[
            pltpu.VMEM((TB, S, 3 * D), jnp.bfloat16),   # staged qkv
            pltpu.VMEM((TB, S, D), jnp.bfloat16),       # per-head context slab
        ],
        compiler_params=pltpu.CompilerParams(
            dimension_semantics=("parallel", "arbitrary"),
            vmem_limit_bytes=vmem_limit),
    )(x, pos, *weights)


# ----------------------------------------------------------------------------
# final: ln_final + text_projection on the gathered EOS rows (one grid step)
# ----------------------------------------------------------------------------
def _final_kernel(x_ref, lng_ref, lnb_ref, proj_ref, o_ref):
    h = _layernorm(x_ref[...], lng_ref[...], lnb_ref[...])             # (B, D)
    o_ref[...] = jnp.dot(h.astype(jnp.bfloat16), proj_ref[...],
                         preferred_element_type=jnp.float32)           # (B, E)


def final_project(x_eos, ln_g, ln_b, proj):
    B, D = x_eos.shape
    E = proj.shape[1]
    return pl.pallas_call(
        _final_kernel,
        out_shape=jax.ShapeDtypeStruct((B, E), jnp.float32),
    )(x_eos, ln_g, ln_b, proj)


# ----------------------------------------------------------------------------
# TextEncoder.forward
# ----------------------------------------------------------------------------
def text_encoder_forward(prompts, tokenized_prompts, params, n_heads, tb_max=4):
    B, S, D = prompts.shape
    S_pad = _pad_seq(S)
    pos = params['pos_emb']
    if S_pad != S:
        prompts = jnp.pad(prompts, ((0, 0), (0, S_pad - S), (0, 0)))
        pos = jnp.pad(pos, ((0, S_pad - S), (0, 0)))

    # pos-emb add is fused into layer 0 of the transformer kernel
    x = transformer_forward(prompts, pos, params, n_heads, tb_max=tb_max)

    # x[arange(B), tokenized_prompts.argmax(-1)] gathered wrapper-side
    eos = jnp.argmax(tokenized_prompts, axis=-1).astype(jnp.int32)      # < S
    x_eos = jnp.take_along_axis(x, eos[:, None, None], axis=1)[:, 0, :]  # (B, D)

    return final_project(x_eos, params['ln_final_g'], params['ln_final_b'],
                         params['text_projection'])


# ----------------------------------------------------------------------------
# deterministic synthetic parameters (CLIP text-transformer shapes, stacked by L)
# ----------------------------------------------------------------------------
def init_params(key, n_layers, d_model, n_heads, embed_dim, seq_len):
    del n_heads
    keys = jax.random.split(key, 10)
    bf16 = jnp.bfloat16
    L, Dm = n_layers, d_model

    def w(k, shape, scale=0.02, dtype=jnp.float32):
        return (scale * jax.random.normal(k, shape)).astype(dtype)

    return {
        'pos_emb': w(keys[0], (seq_len, Dm)),
        'ln_final_g': jnp.ones((1, Dm), jnp.float32),
        'ln_final_b': jnp.zeros((1, Dm), jnp.float32),
        'text_projection': w(keys[1], (Dm, embed_dim), dtype=bf16),
        # per-layer weights stacked along a leading L axis (matmul weights bf16)
        'ln1_g': jnp.ones((L, 1, Dm), jnp.float32),
        'ln1_b': w(keys[2], (L, 1, Dm)),
        'w_qkv': w(keys[3], (L, Dm, 3 * Dm), dtype=bf16),
        'b_qkv': w(keys[4], (L, 1, 3 * Dm)),
        'w_o': w(keys[5], (L, Dm, Dm), dtype=bf16),
        'b_o': w(keys[6], (L, 1, Dm)),
        'ln2_g': jnp.ones((L, 1, Dm), jnp.float32),
        'ln2_b': w(keys[7], (L, 1, Dm)),
        'w_fc': w(keys[8], (L, Dm, 4 * Dm), dtype=bf16),
        'b_fc': jnp.zeros((L, 1, 4 * Dm), jnp.float32),
        'w_proj': w(keys[9], (L, 4 * Dm, Dm), dtype=bf16),
        'b_proj': jnp.zeros((L, 1, Dm), jnp.float32),
    }


# ----------------------------------------------------------------------------
# pure-JAX f32 reference (same bf16-stored weights, f32 math, unpadded)
# ----------------------------------------------------------------------------
def reference_forward(prompts, tokenized, params, n_heads):
    f32 = jnp.float32
    x = prompts + params['pos_emb'][None]
    B, S, D = x.shape
    hd = D // n_heads
    mask = jnp.where(jnp.triu(jnp.ones((S, S)), k=1) > 0, f32(-1e9), f32(0.0))

    def ln(x, g, b):
        mu = x.mean(-1, keepdims=True)
        var = ((x - mu) ** 2).mean(-1, keepdims=True)
        return (x - mu) / jnp.sqrt(var + 1e-5) * g + b

    L = params['w_qkv'].shape[0]
    for l in range(L):
        h = ln(x, params['ln1_g'][l, 0], params['ln1_b'][l, 0])
        qkv = h @ params['w_qkv'][l].astype(f32) + params['b_qkv'][l, 0]
        q, k, v = jnp.split(qkv, 3, axis=-1)
        q = q.reshape(B, S, n_heads, hd)
        k = k.reshape(B, S, n_heads, hd)
        v = v.reshape(B, S, n_heads, hd)
        s = jnp.einsum('bqhd,bkhd->bhqk', q, k) / jnp.sqrt(hd) + mask
        p = jax.nn.softmax(s, axis=-1)
        a = jnp.einsum('bhqk,bkhd->bqhd', p, v).reshape(B, S, D)
        x = x + a @ params['w_o'][l].astype(f32) + params['b_o'][l, 0]
        h2 = ln(x, params['ln2_g'][l, 0], params['ln2_b'][l, 0])
        h2 = h2 @ params['w_fc'][l].astype(f32) + params['b_fc'][l, 0]
        h2 = h2 * jax.nn.sigmoid(1.702 * h2)
        x = x + h2 @ params['w_proj'][l].astype(f32) + params['b_proj'][l, 0]
    x = ln(x, params['ln_final_g'][0], params['ln_final_b'][0])
    eos = jnp.argmax(tokenized, axis=-1)
    return x[jnp.arange(B), eos] @ params['text_projection'].astype(f32)


# ----------------------------------------------------------------------------
if __name__ == "__main__":
    B, S, D, H, L, E = 2, 8, 32, 4, 2, 32    # batch, seq, d_model, heads, layers, embed

    key = jax.random.PRNGKey(0)
    kp, kt, kw = jax.random.split(key, 3)
    prompts = (0.02 * jax.random.normal(kp, (B, S, D))).astype(jnp.float32)
    tokenized_prompts = jax.random.randint(kt, (B, S), 0, 1000, dtype=jnp.int32)
    params = init_params(kw, L, D, H, E, S)

    out = jax.block_until_ready(
        text_encoder_forward(prompts, tokenized_prompts, params, H))
    assert out.shape == (B, E) and out.dtype == jnp.float32

    ref = reference_forward(prompts, tokenized_prompts, params, H)
    # kernel uses bf16 matmul operands (f32 accumulation) + approx reciprocal,
    # reference is f32 math over the same bf16-stored weights -> loose-ish tol.
    max_diff = float(jnp.max(jnp.abs(out - ref)))
    assert bool(jnp.allclose(out, ref, rtol=5e-2, atol=1e-2)), (
        f"mismatch vs reference, max abs diff = {max_diff}")

    print("KERNEL_OK")
</pallas_src>

<mosaic_0001>
module attributes {stable_mosaic.version = 11 : i64} {
  func.func @_transformer_kernel(%arg0: i32, %arg1: i32, %arg2: memref<2x8x32xf32, #tpu.memory_space<vmem>>, %arg3: memref<8x32xf32, #tpu.memory_space<vmem>>, %arg4: memref<1x1x32xf32, #tpu.memory_space<vmem>>, %arg5: memref<1x1x32xf32, #tpu.memory_space<vmem>>, %arg6: memref<1x32x96xbf16, #tpu.memory_space<vmem>>, %arg7: memref<1x1x96xf32, #tpu.memory_space<vmem>>, %arg8: memref<1x32x32xbf16, #tpu.memory_space<vmem>>, %arg9: memref<1x1x32xf32, #tpu.memory_space<vmem>>, %arg10: memref<1x1x32xf32, #tpu.memory_space<vmem>>, %arg11: memref<1x1x32xf32, #tpu.memory_space<vmem>>, %arg12: memref<1x32x128xbf16, #tpu.memory_space<vmem>>, %arg13: memref<1x1x128xf32, #tpu.memory_space<vmem>>, %arg14: memref<1x128x32xbf16, #tpu.memory_space<vmem>>, %arg15: memref<1x1x32xf32, #tpu.memory_space<vmem>>, %arg16: memref<2x8x32xf32, #tpu.memory_space<vmem>>, %arg17: memref<2x8x96xbf16, #tpu.memory_space<vmem>>, %arg18: memref<2x8x32xbf16, #tpu.memory_space<vmem>>) attributes {dimension_semantics = [#tpu.dimension_semantics<parallel>, #tpu.dimension_semantics<arbitrary>], iteration_bounds = array<i64: 1, 2>, scalar_prefetch = 0 : i64, scratch_operands = 2 : i64, tpu.core_type = #tpu.core_type<tc>, window_params = [{transform_indices = @transform_0, window_bounds = array<i64: 2, 8, 32>}, {pipeline_mode = #tpu.pipeline_mode<synchronous>, transform_indices = @transform_1, window_bounds = array<i64: 8, 32>}, {transform_indices = @transform_2, window_bounds = array<i64: 1, 1, 32>}, {transform_indices = @transform_3, window_bounds = array<i64: 1, 1, 32>}, {transform_indices = @transform_4, window_bounds = array<i64: 1, 32, 96>}, {transform_indices = @transform_5, window_bounds = array<i64: 1, 1, 96>}, {transform_indices = @transform_6, window_bounds = array<i64: 1, 32, 32>}, {transform_indices = @transform_7, window_bounds = array<i64: 1, 1, 32>}, {transform_indices = @transform_8, window_bounds = array<i64: 1, 1, 32>}, {transform_indices = @transform_9, window_bounds = array<i64: 1, 1, 32>}, {transform_indices = @transform_10, window_bounds = array<i64: 1, 32, 128>}, {transform_indices = @transform_11, window_bounds = array<i64: 1, 1, 128>}, {transform_indices = @transform_12, window_bounds = array<i64: 1, 128, 32>}, {transform_indices = @transform_13, window_bounds = array<i64: 1, 1, 32>}, {transform_indices = @transform_14, window_bounds = array<i64: 2, 8, 32>}]} {
    %c0_i32 = arith.constant 0 : i32
    %0 = arith.cmpi eq, %arg1, %c0_i32 : i32
    %1 = arith.extui %0 : i1 to i32
    %c0_i32_0 = arith.constant 0 : i32
    %2 = arith.cmpi ne, %1, %c0_i32_0 : i32
    scf.if %2 {
      %c0_189 = arith.constant 0 : index
      %c0_190 = arith.constant 0 : index
      %c0_191 = arith.constant 0 : index
      %315 = vector.load %arg2[%c0_189, %c0_190, %c0_191] : memref<2x8x32xf32, #tpu.memory_space<vmem>>, vector<2x8x32xf32>
      %c0_192 = arith.constant 0 : index
      %c0_193 = arith.constant 0 : index
      %316 = vector.load %arg3[%c0_192, %c0_193] : memref<8x32xf32, #tpu.memory_space<vmem>>, vector<8x32xf32>
      %317 = vector.shape_cast %316 : vector<8x32xf32> to vector<1x8x32xf32>
      %318 = vector.broadcast %317 : vector<1x8x32xf32> to vector<2x8x32xf32>
      %319 = arith.addf %315, %318 : vector<2x8x32xf32>
      %c0_194 = arith.constant 0 : index
      %c0_195 = arith.constant 0 : index
      %c0_196 = arith.constant 0 : index
      %320 = vector.load %arg16[%c0_194, %c0_195, %c0_196] : memref<2x8x32xf32, #tpu.memory_space<vmem>>, vector<2x8x32xf32>
      tpu.vector_store %arg16[%c0_194, %c0_195, %c0_196], %319 {strides = array<i32>} : memref<2x8x32xf32, #tpu.memory_space<vmem>>, vector<2x8x32xf32>,
    } else {
    }
    %c0 = arith.constant 0 : index
    %c0_1 = arith.constant 0 : index
    %c0_2 = arith.constant 0 : index
    %3 = vector.load %arg16[%c0, %c0_1, %c0_2] : memref<2x8x32xf32, #tpu.memory_space<vmem>>, vector<2x8x32xf32>
    %4 = vector.shape_cast %3 : vector<2x8x32xf32> to vector<16x32xf32>
    %5 = tpu.iota {dimensions = array<i32: 0>} : vector<8x8xi32>
    %6 = tpu.iota {dimensions = array<i32: 1>} : vector<8x8xi32>
    %7 = arith.cmpi sgt, %6, %5 : vector<8x8xi32>
    %cst = arith.constant -1.000000e+09 : f32
    %cst_3 = arith.constant 0.000000e+00 : f32
    %8 = vector.broadcast %cst : f32 to vector<8x8xf32>
    %9 = vector.broadcast %cst_3 : f32 to vector<8x8xf32>
    %10 = arith.select %7, %8, %9 : vector<8x8xi1>, vector<8x8xf32>
    %c0_4 = arith.constant 0 : index
    %c0_5 = arith.constant 0 : index
    %c0_6 = arith.constant 0 : index
    %11 = vector.load %arg4[%c0_4, %c0_5, %c0_6] : memref<1x1x32xf32, #tpu.memory_space<vmem>>, vector<1x1x32xf32>
    %12 = vector.shape_cast %11 : vector<1x1x32xf32> to vector<1x32xf32>
    %c0_7 = arith.constant 0 : index
    %c0_8 = arith.constant 0 : index
    %c0_9 = arith.constant 0 : index
    %13 = vector.load %arg5[%c0_7, %c0_8, %c0_9] : memref<1x1x32xf32, #tpu.memory_space<vmem>>, vector<1x1x32xf32>
    %14 = vector.shape_cast %13 : vector<1x1x32xf32> to vector<1x32xf32>
    %cst_10 = arith.constant dense<0.000000e+00> : vector<16xf32>
    %15 = vector.multi_reduction <add>, %4, %cst_10 [1] : vector<16x32xf32> to vector<16xf32>
    %16 = vector.shape_cast %15 : vector<16xf32> to vector<16x1xf32>
    %cst_11 = arith.constant 3.200000e+01 : f32
    %17 = vector.broadcast %cst_11 : f32 to vector<16x1xf32>
    %18 = arith.divf %16, %17 : vector<16x1xf32>
    %19 = vector.broadcast %18 : vector<16x1xf32> to vector<16x32xf32>
    %20 = arith.subf %4, %19 : vector<16x32xf32>
    %21 = arith.mulf %20, %20 : vector<16x32xf32>
    %cst_12 = arith.constant dense<0.000000e+00> : vector<16xf32>
    %22 = vector.multi_reduction <add>, %21, %cst_12 [1] : vector<16x32xf32> to vector<16xf32>
    %23 = vector.shape_cast %22 : vector<16xf32> to vector<16x1xf32>
    %cst_13 = arith.constant 3.200000e+01 : f32
    %24 = vector.broadcast %cst_13 : f32 to vector<16x1xf32>
    %25 = arith.divf %23, %24 : vector<16x1xf32>
    %cst_14 = arith.constant 9.99999974E-6 : f32
    %26 = vector.broadcast %cst_14 : f32 to vector<16x1xf32>
    %27 = arith.addf %25, %26 : vector<16x1xf32>
    %28 = math.rsqrt %27 : vector<16x1xf32>
    %29 = vector.broadcast %28 : vector<16x1xf32> to vector<16x32xf32>
    %30 = arith.mulf %20, %29 : vector<16x32xf32>
    %31 = vector.broadcast %12 : vector<1x32xf32> to vector<16x32xf32>
    %32 = arith.mulf %30, %31 : vector<16x32xf32>
    %33 = vector.broadcast %14 : vector<1x32xf32> to vector<16x32xf32>
    %34 = arith.addf %32, %33 : vector<16x32xf32>
    %35 = arith.truncf %34 : vector<16x32xf32> to vector<16x32xbf16>
    %c0_15 = arith.constant 0 : index
    %c0_16 = arith.constant 0 : index
    %c0_17 = arith.constant 0 : index
    %36 = vector.load %arg6[%c0_15, %c0_16, %c0_17] : memref<1x32x96xbf16, #tpu.memory_space<vmem>>, vector<1x32x96xbf16>
    %37 = vector.shape_cast %36 : vector<1x32x96xbf16> to vector<32x96xbf16>
    %cst_18 = arith.constant dense<0.000000e+00> : vector<16x96xf32>
    %38 = tpu.matmul %35, %37, %cst_18 {dimension_numbers = #tpu.dot_dimension_numbers<[1], [0], [0], [1], [0, 0, 1, 1], [], []>} : vector<16x32xbf16>, vector<32x96xbf16>, vector<16x96xf32> -> vector<16x96xf32>
    %c0_19 = arith.constant 0 : index
    %c0_20 = arith.constant 0 : index
    %c0_21 = arith.constant 0 : index
    %39 = vector.load %arg7[%c0_19, %c0_20, %c0_21] : memref<1x1x96xf32, #tpu.memory_space<vmem>>, vector<1x1x96xf32>
    %40 = vector.shape_cast %39 : vector<1x1x96xf32> to vector<1x96xf32>
    %41 = vector.broadcast %40 : vector<1x96xf32> to vector<16x96xf32>
    %42 = arith.addf %38, %41 : vector<16x96xf32>
    %43 = arith.truncf %42 : vector<16x96xf32> to vector<16x96xbf16>
    %44 = vector.shape_cast %43 : vector<16x96xbf16> to vector<2x8x96xbf16>
    %c0_22 = arith.constant 0 : index
    %c0_23 = arith.constant 0 : index
    %c0_24 = arith.constant 0 : index
    %45 = vector.load %arg17[%c0_22, %c0_23, %c0_24] : memref<2x8x96xbf16, #tpu.memory_space<vmem>>, vector<2x8x96xbf16>
    tpu.vector_store %arg17[%c0_22, %c0_23, %c0_24], %44 {strides = array<i32>} : memref<2x8x96xbf16, #tpu.memory_space<vmem>>, vector<2x8x96xbf16>,
    %c0_25 = arith.constant 0 : index
    %c0_26 = arith.constant 0 : index
    %c0_27 = arith.constant 0 : index
    %46 = vector.load %arg17[%c0_25, %c0_26, %c0_27] : memref<2x8x96xbf16, #tpu.memory_space<vmem>>, vector<1x8x8xbf16>
    %47 = vector.shape_cast %46 : vector<1x8x8xbf16> to vector<8x8xbf16>
    %c0_28 = arith.constant 0 : index
    %c0_29 = arith.constant 0 : index
    %c32 = arith.constant 32 : index
    %48 = vector.load %arg17[%c0_28, %c0_29, %c32] : memref<2x8x96xbf16, #tpu.memory_space<vmem>>, vector<1x8x8xbf16>
    %49 = vector.shape_cast %48 : vector<1x8x8xbf16> to vector<8x8xbf16>
    %c0_30 = arith.constant 0 : index
    %c0_31 = arith.constant 0 : index
    %c64 = arith.constant 64 : index
    %50 = vector.load %arg17[%c0_30, %c0_31, %c64] : memref<2x8x96xbf16, #tpu.memory_space<vmem>>, vector<1x8x8xbf16>
    %51 = vector.shape_cast %50 : vector<1x8x8xbf16> to vector<8x8xbf16>
    %cst_32 = arith.constant dense<0.000000e+00> : vector<8x8xf32>
    %52 = tpu.matmul %47, %49, %cst_32 {dimension_numbers = #tpu.dot_dimension_numbers<[1], [1], [0], [0], [0, 0, 1, 0], [], []>} : vector<8x8xbf16>, vector<8x8xbf16>, vector<8x8xf32> -> vector<8x8xf32>
    %cst_33 = arith.constant 0.353553385 : f32
    %53 = vector.broadcast %cst_33 : f32 to vector<8x8xf32>
    %54 = arith.mulf %52, %53 : vector<8x8xf32>
    %55 = arith.addf %54, %10 : vector<8x8xf32>
    %cst_34 = arith.constant dense<0xFF800000> : vector<8xf32>
    %56 = vector.multi_reduction <maximumf>, %55, %cst_34 [1] : vector<8x8xf32> to vector<8xf32>
    %57 = vector.shape_cast %56 : vector<8xf32> to vector<8x1xf32>
    %58 = vector.broadcast %57 : vector<8x1xf32> to vector<8x8xf32>
    %59 = arith.subf %55, %58 : vector<8x8xf32>
    %60 = math.exp %59 : vector<8x8xf32>
    %cst_35 = arith.constant dense<0.000000e+00> : vector<8xf32>
    %61 = vector.multi_reduction <add>, %60, %cst_35 [1] : vector<8x8xf32> to vector<8xf32>
    %62 = vector.shape_cast %61 : vector<8xf32> to vector<8x1xf32>
    %63 = tpu.reciprocal %62 {approx = true} : vector<8x1xf32> -> vector<8x1xf32>
    %64 = vector.broadcast %63 : vector<8x1xf32> to vector<8x8xf32>
    %65 = arith.mulf %60, %64 : vector<8x8xf32>
    %66 = arith.truncf %65 : vector<8x8xf32> to vector<8x8xbf16>
    %cst_36 = arith.constant dense<0.000000e+00> : vector<8x8xf32>
    %67 = tpu.matmul %66, %51, %cst_36 {dimension_numbers = #tpu.dot_dimension_numbers<[1], [0], [0], [1], [0, 0, 1, 1], [], []>} : vector<8x8xbf16>, vector<8x8xbf16>, vector<8x8xf32> -> vector<8x8xf32>
    %68 = arith.truncf %67 : vector<8x8xf32> to vector<8x8xbf16>
    %c0_37 = arith.constant 0 : index
    %c0_38 = arith.constant 0 : index
    %c0_39 = arith.constant 0 : index
    %69 = vector.load %arg18[%c0_37, %c0_38, %c0_39] : memref<2x8x32xbf16, #tpu.memory_space<vmem>>, vector<1x8x8xbf16>
    %70 = vector.shape_cast %69 : vector<1x8x8xbf16> to vector<8x8xbf16>
    %71 = vector.shape_cast %68 : vector<8x8xbf16> to vector<1x8x8xbf16>
    tpu.vector_store %arg18[%c0_37, %c0_38, %c0_39], %71 {strides = array<i32>} : memref<2x8x32xbf16, #tpu.memory_space<vmem>>, vector<1x8x8xbf16>,
    %c0_40 = arith.constant 0 : index
    %c0_41 = arith.constant 0 : index
    %c8 = arith.constant 8 : index
    %72 = vector.load %arg17[%c0_40, %c0_41, %c8] : memref<2x8x96xbf16, #tpu.memory_space<vmem>>, vector<1x8x8xbf16>
    %73 = vector.shape_cast %72 : vector<1x8x8xbf16> to vector<8x8xbf16>
    %c0_42 = arith.constant 0 : index
    %c0_43 = arith.constant 0 : index
    %c40 = arith.constant 40 : index
    %74 = vector.load %arg17[%c0_42, %c0_43, %c40] : memref<2x8x96xbf16, #tpu.memory_space<vmem>>, vector<1x8x8xbf16>
    %75 = vector.shape_cast %74 : vector<1x8x8xbf16> to vector<8x8xbf16>
    %c0_44 = arith.constant 0 : index
    %c0_45 = arith.constant 0 : index
    %c72 = arith.constant 72 : index
    %76 = vector.load %arg17[%c0_44, %c0_45, %c72] : memref<2x8x96xbf16, #tpu.memory_space<vmem>>, vector<1x8x8xbf16>
    %77 = vector.shape_cast %76 : vector<1x8x8xbf16> to vector<8x8xbf16>
    %cst_46 = arith.constant dense<0.000000e+00> : vector<8x8xf32>
    %78 = tpu.matmul %73, %75, %cst_46 {dimension_numbers = #tpu.dot_dimension_numbers<[1], [1], [0], [0], [0, 0, 1, 0], [], []>} : vector<8x8xbf16>, vector<8x8xbf16>, vector<8x8xf32> -> vector<8x8xf32>
    %cst_47 = arith.constant 0.353553385 : f32
    %79 = vector.broadcast %cst_47 : f32 to vector<8x8xf32>
    %80 = arith.mulf %78, %79 : vector<8x8xf32>
    %81 = arith.addf %80, %10 : vector<8x8xf32>
    %cst_48 = arith.constant dense<0xFF800000> : vector<8xf32>
    %82 = vector.multi_reduction <maximumf>, %81, %cst_48 [1] : vector<8x8xf32> to vector<8xf32>
    %83 = vector.shape_cast %82 : vector<8xf32> to vector<8x1xf32>
    %84 = vector.broadcast %83 : vector<8x1xf32> to vector<8x8xf32>
    %85 = arith.subf %81, %84 : vector<8x8xf32>
    %86 = math.exp %85 : vector<8x8xf32>
    %cst_49 = arith.constant dense<0.000000e+00> : vector<8xf32>
    %87 = vector.multi_reduction <add>, %86, %cst_49 [1] : vector<8x8xf32> to vector<8xf32>
    %88 = vector.shape_cast %87 : vector<8xf32> to vector<8x1xf32>
    %89 = tpu.reciprocal %88 {approx = true} : vector<8x1xf32> -> vector<8x1xf32>
    %90 = vector.broadcast %89 : vector<8x1xf32> to vector<8x8xf32>
    %91 = arith.mulf %86, %90 : vector<8x8xf32>
    %92 = arith.truncf %91 : vector<8x8xf32> to vector<8x8xbf16>
    %cst_50 = arith.constant dense<0.000000e+00> : vector<8x8xf32>
    %93 = tpu.matmul %92, %77, %cst_50 {dimension_numbers = #tpu.dot_dimension_numbers<[1], [0], [0], [1], [0, 0, 1, 1], [], []>} : vector<8x8xbf16>, vector<8x8xbf16>, vector<8x8xf32> -> vector<8x8xf32>
    %94 = arith.truncf %93 : vector<8x8xf32> to vector<8x8xbf16>
    %c0_51 = arith.constant 0 : index
    %c0_52 = arith.constant 0 : index
    %c8_53 = arith.constant 8 : index
    %95 = vector.load %arg18[%c0_51, %c0_52, %c8_53] : memref<2x8x32xbf16, #tpu.memory_space<vmem>>, vector<1x8x8xbf16>
    %96 = vector.shape_cast %95 : vector<1x8x8xbf16> to vector<8x8xbf16>
    %97 = vector.shape_cast %94 : vector<8x8xbf16> to vector<1x8x8xbf16>
    tpu.vector_store %arg18[%c0_51, %c0_52, %c8_53], %97 {strides = array<i32>} : memref<2x8x32xbf16, #tpu.memory_space<vmem>>, vector<1x8x8xbf16>,
    %c0_54 = arith.constant 0 : index
    %c0_55 = arith.constant 0 : index
    %c16 = arith.constant 16 : index
    %98 = vector.load %arg17[%c0_54, %c0_55, %c16] : memref<2x8x96xbf16, #tpu.memory_space<vmem>>, vector<1x8x8xbf16>
    %99 = vector.shape_cast %98 : vector<1x8x8xbf16> to vector<8x8xbf16>
    %c0_56 = arith.constant 0 : index
    %c0_57 = arith.constant 0 : index
    %c48 = arith.constant 48 : index
    %100 = vector.load %arg17[%c0_56, %c0_57, %c48] : memref<2x8x96xbf16, #tpu.memory_space<vmem>>, vector<1x8x8xbf16>
    %101 = vector.shape_cast %100 : vector<1x8x8xbf16> to vector<8x8xbf16>
    %c0_58 = arith.constant 0 : index
    %c0_59 = arith.constant 0 : index
    %c80 = arith.constant 80 : index
    %102 = vector.load %arg17[%c0_58, %c0_59, %c80] : memref<2x8x96xbf16, #tpu.memory_space<vmem>>, vector<1x8x8xbf16>
    %103 = vector.shape_cast %102 : vector<1x8x8xbf16> to vector<8x8xbf16>
    %cst_60 = arith.constant dense<0.000000e+00> : vector<8x8xf32>
    %104 = tpu.matmul %99, %101, %cst_60 {dimension_numbers = #tpu.dot_dimension_numbers<[1], [1], [0], [0], [0, 0, 1, 0], [], []>} : vector<8x8xbf16>, vector<8x8xbf16>, vector<8x8xf32> -> vector<8x8xf32>
    %cst_61 = arith.constant 0.353553385 : f32
    %105 = vector.broadcast %cst_61 : f32 to vector<8x8xf32>
    %106 = arith.mulf %104, %105 : vector<8x8xf32>
    %107 = arith.addf %106, %10 : vector<8x8xf32>
    %cst_62 = arith.constant dense<0xFF800000> : vector<8xf32>
    %108 = vector.multi_reduction <maximumf>, %107, %cst_62 [1] : vector<8x8xf32> to vector<8xf32>
    %109 = vector.shape_cast %108 : vector<8xf32> to vector<8x1xf32>
    %110 = vector.broadcast %109 : vector<8x1xf32> to vector<8x8xf32>
    %111 = arith.subf %107, %110 : vector<8x8xf32>
    %112 = math.exp %111 : vector<8x8xf32>
    %cst_63 = arith.constant dense<0.000000e+00> : vector<8xf32>
    %113 = vector.multi_reduction <add>, %112, %cst_63 [1] : vector<8x8xf32> to vector<8xf32>
    %114 = vector.shape_cast %113 : vector<8xf32> to vector<8x1xf32>
    %115 = tpu.reciprocal %114 {approx = true} : vector<8x1xf32> -> vector<8x1xf32>
    %116 = vector.broadcast %115 : vector<8x1xf32> to vector<8x8xf32>
    %117 = arith.mulf %112, %116 : vector<8x8xf32>
    %118 = arith.truncf %117 : vector<8x8xf32> to vector<8x8xbf16>
    %cst_64 = arith.constant dense<0.000000e+00> : vector<8x8xf32>
    %119 = tpu.matmul %118, %103, %cst_64 {dimension_numbers = #tpu.dot_dimension_numbers<[1], [0], [0], [1], [0, 0, 1, 1], [], []>} : vector<8x8xbf16>, vector<8x8xbf16>, vector<8x8xf32> -> vector<8x8xf32>
    %120 = arith.truncf %119 : vector<8x8xf32> to vector<8x8xbf16>
    %c0_65 = arith.constant 0 : index
    %c0_66 = arith.constant 0 : index
    %c16_67 = arith.constant 16 : index
    %121 = vector.load %arg18[%c0_65, %c0_66, %c16_67] : memref<2x8x32xbf16, #tpu.memory_space<vmem>>, vector<1x8x8xbf16>
    %122 = vector.shape_cast %121 : vector<1x8x8xbf16> to vector<8x8xbf16>
    %123 = vector.shape_cast %120 : vector<8x8xbf16> to vector<1x8x8xbf16>
    tpu.vector_store %arg18[%c0_65, %c0_66, %c16_67], %123 {strides = array<i32>} : memref<2x8x32xbf16, #tpu.memory_space<vmem>>, vector<1x8x8xbf16>,
    %c0_68 = arith.constant 0 : index
    %c0_69 = arith.constant 0 : index
    %c24 = arith.constant 24 : index
    %124 = vector.load %arg17[%c0_68, %c0_69, %c24] : memref<2x8x96xbf16, #tpu.memory_space<vmem>>, vector<1x8x8xbf16>
    %125 = vector.shape_cast %124 : vector<1x8x8xbf16> to vector<8x8xbf16>
    %c0_70 = arith.constant 0 : index
    %c0_71 = arith.constant 0 : index
    %c56 = arith.constant 56 : index
    %126 = vector.load %arg17[%c0_70, %c0_71, %c56] : memref<2x8x96xbf16, #tpu.memory_space<vmem>>, vector<1x8x8xbf16>
    %127 = vector.shape_cast %126 : vector<1x8x8xbf16> to vector<8x8xbf16>
    %c0_72 = arith.constant 0 : index
    %c0_73 = arith.constant 0 : index
    %c88 = arith.constant 88 : index
    %128 = vector.load %arg17[%c0_72, %c0_73, %c88] : memref<2x8x96xbf16, #tpu.memory_space<vmem>>, vector<1x8x8xbf16>
    %129 = vector.shape_cast %128 : vector<1x8x8xbf16> to vector<8x8xbf16>
    %cst_74 = arith.constant dense<0.000000e+00> : vector<8x8xf32>
    %130 = tpu.matmul %125, %127, %cst_74 {dimension_numbers = #tpu.dot_dimension_numbers<[1], [1], [0], [0], [0, 0, 1, 0], [], []>} : vector<8x8xbf16>, vector<8x8xbf16>, vector<8x8xf32> -> vector<8x8xf32>
    %cst_75 = arith.constant 0.353553385 : f32
    %131 = vector.broadcast %cst_75 : f32 to vector<8x8xf32>
    %132 = arith.mulf %130, %131 : vector<8x8xf32>
    %133 = arith.addf %132, %10 : vector<8x8xf32>
    %cst_76 = arith.constant dense<0xFF800000> : vector<8xf32>
    %134 = vector.multi_reduction <maximumf>, %133, %cst_76 [1] : vector<8x8xf32> to vector<8xf32>
    %135 = vector.shape_cast %134 : vector<8xf32> to vector<8x1xf32>
    %136 = vector.broadcast %135 : vector<8x1xf32> to vector<8x8xf32>
    %137 = arith.subf %133, %136 : vector<8x8xf32>
    %138 = math.exp %137 : vector<8x8xf32>
    %cst_77 = arith.constant dense<0.000000e+00> : vector<8xf32>
    %139 = vector.multi_reduction <add>, %138, %cst_77 [1] : vector<8x8xf32> to vector<8xf32>
    %140 = vector.shape_cast %139 : vector<8xf32> to vector<8x1xf32>
    %141 = tpu.reciprocal %140 {approx = true} : vector<8x1xf32> -> vector<8x1xf32>
    %142 = vector.broadcast %141 : vector<8x1xf32> to vector<8x8xf32>
    %143 = arith.mulf %138, %142 : vector<8x8xf32>
    %144 = arith.truncf %143 : vector<8x8xf32> to vector<8x8xbf16>
    %cst_78 = arith.constant dense<0.000000e+00> : vector<8x8xf32>
    %145 = tpu.matmul %144, %129, %cst_78 {dimension_numbers = #tpu.dot_dimension_numbers<[1], [0], [0], [1], [0, 0, 1, 1], [], []>} : vector<8x8xbf16>, vector<8x8xbf16>, vector<8x8xf32> -> vector<8x8xf32>
    %146 = arith.truncf %145 : vector<8x8xf32> to vector<8x8xbf16>
    %c0_79 = arith.constant 0 : index
    %c0_80 = arith.constant 0 : index
    %c24_81 = arith.constant 24 : index
    %147 = vector.load %arg18[%c0_79, %c0_80, %c24_81] : memref<2x8x32xbf16, #tpu.memory_space<vmem>>, vector<1x8x8xbf16>
    %148 = vector.shape_cast %147 : vector<1x8x8xbf16> to vector<8x8xbf16>
    %149 = vector.shape_cast %146 : vector<8x8xbf16> to vector<1x8x8xbf16>
    tpu.vector_store %arg18[%c0_79, %c0_80, %c24_81], %149 {strides = array<i32>} : memref<2x8x32xbf16, #tpu.memory_space<vmem>>, vector<1x8x8xbf16>,
    %c1 = arith.constant 1 : index
    %c0_82 = arith.constant 0 : index
    %c0_83 = arith.constant 0 : index
    %150 = vector.load %arg17[%c1, %c0_82, %c0_83] : memref<2x8x96xbf16, #tpu.memory_space<vmem>>, vector<1x8x8xbf16>
    %151 = vector.shape_cast %150 : vector<1x8x8xbf16> to vector<8x8xbf16>
    %c1_84 = arith.constant 1 : index
    %c0_85 = arith.constant 0 : index
    %c32_86 = arith.constant 32 : index
    %152 = vector.load %arg17[%c1_84, %c0_85, %c32_86] : memref<2x8x96xbf16, #tpu.memory_space<vmem>>, vector<1x8x8xbf16>
    %153 = vector.shape_cast %152 : vector<1x8x8xbf16> to vector<8x8xbf16>
    %c1_87 = arith.constant 1 : index
    %c0_88 = arith.constant 0 : index
    %c64_89 = arith.constant 64 : index
    %154 = vector.load %arg17[%c1_87, %c0_88, %c64_89] : memref<2x8x96xbf16, #tpu.memory_space<vmem>>, vector<1x8x8xbf16>
    %155 = vector.shape_cast %154 : vector<1x8x8xbf16> to vector<8x8xbf16>
    %cst_90 = arith.constant dense<0.000000e+00> : vector<8x8xf32>
    %156 = tpu.matmul %151, %153, %cst_90 {dimension_numbers = #tpu.dot_dimension_numbers<[1], [1], [0], [0], [0, 0, 1, 0], [], []>} : vector<8x8xbf16>, vector<8x8xbf16>, vector<8x8xf32> -> vector<8x8xf32>
    %cst_91 = arith.constant 0.353553385 : f32
    %157 = vector.broadcast %cst_91 : f32 to vector<8x8xf32>
    %158 = arith.mulf %156, %157 : vector<8x8xf32>
    %159 = arith.addf %158, %10 : vector<8x8xf32>
    %cst_92 = arith.constant dense<0xFF800000> : vector<8xf32>
    %160 = vector.multi_reduction <maximumf>, %159, %cst_92 [1] : vector<8x8xf32> to vector<8xf32>
    %161 = vector.shape_cast %160 : vector<8xf32> to vector<8x1xf32>
    %162 = vector.broadcast %161 : vector<8x1xf32> to vector<8x8xf32>
    %163 = arith.subf %159, %162 : vector<8x8xf32>
    %164 = math.exp %163 : vector<8x8xf32>
    %cst_93 = arith.constant dense<0.000000e+00> : vector<8xf32>
    %165 = vector.multi_reduction <add>, %164, %cst_93 [1] : vector<8x8xf32> to vector<8xf32>
    %166 = vector.shape_cast %165 : vector<8xf32> to vector<8x1xf32>
    %167 = tpu.reciprocal %166 {approx = true} : vector<8x1xf32> -> vector<8x1xf32>
    %168 = vector.broadcast %167 : vector<8x1xf32> to vector<8x8xf32>
    %169 = arith.mulf %164, %168 : vector<8x8xf32>
    %170 = arith.truncf %169 : vector<8x8xf32> to vector<8x8xbf16>
    %cst_94 = arith.constant dense<0.000000e+00> : vector<8x8xf32>
    %171 = tpu.matmul %170, %155, %cst_94 {dimension_numbers = #tpu.dot_dimension_numbers<[1], [0], [0], [1], [0, 0, 1, 1], [], []>} : vector<8x8xbf16>, vector<8x8xbf16>, vector<8x8xf32> -> vector<8x8xf32>
    %172 = arith.truncf %171 : vector<8x8xf32> to vector<8x8xbf16>
    %c1_95 = arith.constant 1 : index
    %c0_96 = arith.constant 0 : index
    %c0_97 = arith.constant 0 : index
    %173 = vector.load %arg18[%c1_95, %c0_96, %c0_97] : memref<2x8x32xbf16, #tpu.memory_space<vmem>>, vector<1x8x8xbf16>
    %174 = vector.shape_cast %173 : vector<1x8x8xbf16> to vector<8x8xbf16>
    %175 = vector.shape_cast %172 : vector<8x8xbf16> to vector<1x8x8xbf16>
    tpu.vector_store %arg18[%c1_95, %c0_96, %c0_97], %175 {strides = array<i32>} : memref<2x8x32xbf16, #tpu.memory_space<vmem>>, vector<1x8x8xbf16>,
    %c1_98 = arith.constant 1 : index
    %c0_99 = arith.constant 0 : index
    %c8_100 = arith.constant 8 : index
    %176 = vector.load %arg17[%c1_98, %c0_99, %c8_100] : memref<2x8x96xbf16, #tpu.memory_space<vmem>>, vector<1x8x8xbf16>
    %177 = vector.shape_cast %176 : vector<1x8x8xbf16> to vector<8x8xbf16>
    %c1_101 = arith.constant 1 : index
    %c0_102 = arith.constant 0 : index
    %c40_103 = arith.constant 40 : index
    %178 = vector.load %arg17[%c1_101, %c0_102, %c40_103] : memref<2x8x96xbf16, #tpu.memory_space<vmem>>, vector<1x8x8xbf16>
    %179 = vector.shape_cast %178 : vector<1x8x8xbf16> to vector<8x8xbf16>
    %c1_104 = arith.constant 1 : index
    %c0_105 = arith.constant 0 : index
    %c72_106 = arith.constant 72 : index
    %180 = vector.load %arg17[%c1_104, %c0_105, %c72_106] : memref<2x8x96xbf16, #tpu.memory_space<vmem>>, vector<1x8x8xbf16>
    %181 = vector.shape_cast %180 : vector<1x8x8xbf16> to vector<8x8xbf16>
    %cst_107 = arith.constant dense<0.000000e+00> : vector<8x8xf32>
    %182 = tpu.matmul %177, %179, %cst_107 {dimension_numbers = #tpu.dot_dimension_numbers<[1], [1], [0], [0], [0, 0, 1, 0], [], []>} : vector<8x8xbf16>, vector<8x8xbf16>, vector<8x8xf32> -> vector<8x8xf32>
    %cst_108 = arith.constant 0.353553385 : f32
    %183 = vector.broadcast %cst_108 : f32 to vector<8x8xf32>
    %184 = arith.mulf %182, %183 : vector<8x8xf32>
    %185 = arith.addf %184, %10 : vector<8x8xf32>
    %cst_109 = arith.constant dense<0xFF800000> : vector<8xf32>
    %186 = vector.multi_reduction <maximumf>, %185, %cst_109 [1] : vector<8x8xf32> to vector<8xf32>
    %187 = vector.shape_cast %186 : vector<8xf32> to vector<8x1xf32>
    %188 = vector.broadcast %187 : vector<8x1xf32> to vector<8x8xf32>
    %189 = arith.subf %185, %188 : vector<8x8xf32>
    %190 = math.exp %189 : vector<8x8xf32>
    %cst_110 = arith.constant dense<0.000000e+00> : vector<8xf32>
    %191 = vector.multi_reduction <add>, %190, %cst_110 [1] : vector<8x8xf32> to vector<8xf32>
    %192 = vector.shape_cast %191 : vector<8xf32> to vector<8x1xf32>
    %193 = tpu.reciprocal %192 {approx = true} : vector<8x1xf32> -> vector<8x1xf32>
    %194 = vector.broadcast %193 : vector<8x1xf32> to vector<8x8xf32>
    %195 = arith.mulf %190, %194 : vector<8x8xf32>
    %196 = arith.truncf %195 : vector<8x8xf32> to vector<8x8xbf16>
    %cst_111 = arith.constant dense<0.000000e+00> : vector<8x8xf32>
    %197 = tpu.matmul %196, %181, %cst_111 {dimension_numbers = #tpu.dot_dimension_numbers<[1], [0], [0], [1], [0, 0, 1, 1], [], []>} : vector<8x8xbf16>, vector<8x8xbf16>, vector<8x8xf32> -> vector<8x8xf32>
    %198 = arith.truncf %197 : vector<8x8xf32> to vector<8x8xbf16>
    %c1_112 = arith.constant 1 : index
    %c0_113 = arith.constant 0 : index
    %c8_114 = arith.constant 8 : index
    %199 = vector.load %arg18[%c1_112, %c0_113, %c8_114] : memref<2x8x32xbf16, #tpu.memory_space<vmem>>, vector<1x8x8xbf16>
    %200 = vector.shape_cast %199 : vector<1x8x8xbf16> to vector<8x8xbf16>
    %201 = vector.shape_cast %198 : vector<8x8xbf16> to vector<1x8x8xbf16>
    tpu.vector_store %arg18[%c1_112, %c0_113, %c8_114], %201 {strides = array<i32>} : memref<2x8x32xbf16, #tpu.memory_space<vmem>>, vector<1x8x8xbf16>,
    %c1_115 = arith.constant 1 : index
    %c0_116 = arith.constant 0 : index
    %c16_117 = arith.constant 16 : index
    %202 = vector.load %arg17[%c1_115, %c0_116, %c16_117] : memref<2x8x96xbf16, #tpu.memory_space<vmem>>, vector<1x8x8xbf16>
    %203 = vector.shape_cast %202 : vector<1x8x8xbf16> to vector<8x8xbf16>
    %c1_118 = arith.constant 1 : index
    %c0_119 = arith.constant 0 : index
    %c48_120 = arith.constant 48 : index
    %204 = vector.load %arg17[%c1_118, %c0_119, %c48_120] : memref<2x8x96xbf16, #tpu.memory_space<vmem>>, vector<1x8x8xbf16>
    %205 = vector.shape_cast %204 : vector<1x8x8xbf16> to vector<8x8xbf16>
    %c1_121 = arith.constant 1 : index
    %c0_122 = arith.constant 0 : index
    %c80_123 = arith.constant 80 : index
    %206 = vector.load %arg17[%c1_121, %c0_122, %c80_123] : memref<2x8x96xbf16, #tpu.memory_space<vmem>>, vector<1x8x8xbf16>
    %207 = vector.shape_cast %206 : vector<1x8x8xbf16> to vector<8x8xbf16>
    %cst_124 = arith.constant dense<0.000000e+00> : vector<8x8xf32>
    %208 = tpu.matmul %203, %205, %cst_124 {dimension_numbers = #tpu.dot_dimension_numbers<[1], [1], [0], [0], [0, 0, 1, 0], [], []>} : vector<8x8xbf16>, vector<8x8xbf16>, vector<8x8xf32> -> vector<8x8xf32>
    %cst_125 = arith.constant 0.353553385 : f32
    %209 = vector.broadcast %cst_125 : f32 to vector<8x8xf32>
    %210 = arith.mulf %208, %209 : vector<8x8xf32>
    %211 = arith.addf %210, %10 : vector<8x8xf32>
    %cst_126 = arith.constant dense<0xFF800000> : vector<8xf32>
    %212 = vector.multi_reduction <maximumf>, %211, %cst_126 [1] : vector<8x8xf32> to vector<8xf32>
    %213 = vector.shape_cast %212 : vector<8xf32> to vector<8x1xf32>
    %214 = vector.broadcast %213 : vector<8x1xf32> to vector<8x8xf32>
    %215 = arith.subf %211, %214 : vector<8x8xf32>
    %216 = math.exp %215 : vector<8x8xf32>
    %cst_127 = arith.constant dense<0.000000e+00> : vector<8xf32>
    %217 = vector.multi_reduction <add>, %216, %cst_127 [1] : vector<8x8xf32> to vector<8xf32>
    %218 = vector.shape_cast %217 : vector<8xf32> to vector<8x1xf32>
    %219 = tpu.reciprocal %218 {approx = true} : vector<8x1xf32> -> vector<8x1xf32>
    %220 = vector.broadcast %219 : vector<8x1xf32> to vector<8x8xf32>
    %221 = arith.mulf %216, %220 : vector<8x8xf32>
    %222 = arith.truncf %221 : vector<8x8xf32> to vector<8x8xbf16>
    %cst_128 = arith.constant dense<0.000000e+00> : vector<8x8xf32>
    %223 = tpu.matmul %222, %207, %cst_128 {dimension_numbers = #tpu.dot_dimension_numbers<[1], [0], [0], [1], [0, 0, 1, 1], [], []>} : vector<8x8xbf16>, vector<8x8xbf16>, vector<8x8xf32> -> vector<8x8xf32>
    %224 = arith.truncf %223 : vector<8x8xf32> to vector<8x8xbf16>
    %c1_129 = arith.constant 1 : index
    %c0_130 = arith.constant 0 : index
    %c16_131 = arith.constant 16 : index
    %225 = vector.load %arg18[%c1_129, %c0_130, %c16_131] : memref<2x8x32xbf16, #tpu.memory_space<vmem>>, vector<1x8x8xbf16>
    %226 = vector.shape_cast %225 : vector<1x8x8xbf16> to vector<8x8xbf16>
    %227 = vector.shape_cast %224 : vector<8x8xbf16> to vector<1x8x8xbf16>
    tpu.vector_store %arg18[%c1_129, %c0_130, %c16_131], %227 {strides = array<i32>} : memref<2x8x32xbf16, #tpu.memory_space<vmem>>, vector<1x8x8xbf16>,
    %c1_132 = arith.constant 1 : index
    %c0_133 = arith.constant 0 : index
    %c24_134 = arith.constant 24 : index
    %228 = vector.load %arg17[%c1_132, %c0_133, %c24_134] : memref<2x8x96xbf16, #tpu.memory_space<vmem>>, vector<1x8x8xbf16>
    %229 = vector.shape_cast %228 : vector<1x8x8xbf16> to vector<8x8xbf16>
    %c1_135 = arith.constant 1 : index
    %c0_136 = arith.constant 0 : index
    %c56_137 = arith.constant 56 : index
    %230 = vector.load %arg17[%c1_135, %c0_136, %c56_137] : memref<2x8x96xbf16, #tpu.memory_space<vmem>>, vector<1x8x8xbf16>
    %231 = vector.shape_cast %230 : vector<1x8x8xbf16> to vector<8x8xbf16>
    %c1_138 = arith.constant 1 : index
    %c0_139 = arith.constant 0 : index
    %c88_140 = arith.constant 88 : index
    %232 = vector.load %arg17[%c1_138, %c0_139, %c88_140] : memref<2x8x96xbf16, #tpu.memory_space<vmem>>, vector<1x8x8xbf16>
    %233 = vector.shape_cast %232 : vector<1x8x8xbf16> to vector<8x8xbf16>
    %cst_141 = arith.constant dense<0.000000e+00> : vector<8x8xf32>
    %234 = tpu.matmul %229, %231, %cst_141 {dimension_numbers = #tpu.dot_dimension_numbers<[1], [1], [0], [0], [0, 0, 1, 0], [], []>} : vector<8x8xbf16>, vector<8x8xbf16>, vector<8x8xf32> -> vector<8x8xf32>
    %cst_142 = arith.constant 0.353553385 : f32
    %235 = vector.broadcast %cst_142 : f32 to vector<8x8xf32>
    %236 = arith.mulf %234, %235 : vector<8x8xf32>
    %237 = arith.addf %236, %10 : vector<8x8xf32>
    %cst_143 = arith.constant dense<0xFF800000> : vector<8xf32>
    %238 = vector.multi_reduction <maximumf>, %237, %cst_143 [1] : vector<8x8xf32> to vector<8xf32>
    %239 = vector.shape_cast %238 : vector<8xf32> to vector<8x1xf32>
    %240 = vector.broadcast %239 : vector<8x1xf32> to vector<8x8xf32>
    %241 = arith.subf %237, %240 : vector<8x8xf32>
    %242 = math.exp %241 : vector<8x8xf32>
    %cst_144 = arith.constant dense<0.000000e+00> : vector<8xf32>
    %243 = vector.multi_reduction <add>, %242, %cst_144 [1] : vector<8x8xf32> to vector<8xf32>
    %244 = vector.shape_cast %243 : vector<8xf32> to vector<8x1xf32>
    %245 = tpu.reciprocal %244 {approx = true} : vector<8x1xf32> -> vector<8x1xf32>
    %246 = vector.broadcast %245 : vector<8x1xf32> to vector<8x8xf32>
    %247 = arith.mulf %242, %246 : vector<8x8xf32>
    %248 = arith.truncf %247 : vector<8x8xf32> to vector<8x8xbf16>
    %cst_145 = arith.constant dense<0.000000e+00> : vector<8x8xf32>
    %249 = tpu.matmul %248, %233, %cst_145 {dimension_numbers = #tpu.dot_dimension_numbers<[1], [0], [0], [1], [0, 0, 1, 1], [], []>} : vector<8x8xbf16>, vector<8x8xbf16>, vector<8x8xf32> -> vector<8x8xf32>
    %250 = arith.truncf %249 : vector<8x8xf32> to vector<8x8xbf16>
    %c1_146 = arith.constant 1 : index
    %c0_147 = arith.constant 0 : index
    %c24_148 = arith.constant 24 : index
    %251 = vector.load %arg18[%c1_146, %c0_147, %c24_148] : memref<2x8x32xbf16, #tpu.memory_space<vmem>>, vector<1x8x8xbf16>
    %252 = vector.shape_cast %251 : vector<1x8x8xbf16> to vector<8x8xbf16>
    %253 = vector.shape_cast %250 : vector<8x8xbf16> to vector<1x8x8xbf16>
    tpu.vector_store %arg18[%c1_146, %c0_147, %c24_148], %253 {strides = array<i32>} : memref<2x8x32xbf16, #tpu.memory_space<vmem>>, vector<1x8x8xbf16>,
    %c0_149 = arith.constant 0 : index
    %c0_150 = arith.constant 0 : index
    %c0_151 = arith.constant 0 : index
    %254 = vector.load %arg18[%c0_149, %c0_150, %c0_151] : memref<2x8x32xbf16, #tpu.memory_space<vmem>>, vector<2x8x32xbf16>
    %255 = vector.shape_cast %254 : vector<2x8x32xbf16> to vector<16x32xbf16>
    %c0_152 = arith.constant 0 : index
    %c0_153 = arith.constant 0 : index
    %c0_154 = arith.constant 0 : index
    %256 = vector.load %arg8[%c0_152, %c0_153, %c0_154] : memref<1x32x32xbf16, #tpu.memory_space<vmem>>, vector<1x32x32xbf16>
    %257 = vector.shape_cast %256 : vector<1x32x32xbf16> to vector<32x32xbf16>
    %cst_155 = arith.constant dense<0.000000e+00> : vector<16x32xf32>
    %258 = tpu.matmul %255, %257, %cst_155 {dimension_numbers = #tpu.dot_dimension_numbers<[1], [0], [0], [1], [0, 0, 1, 1], [], []>} : vector<16x32xbf16>, vector<32x32xbf16>, vector<16x32xf32> -> vector<16x32xf32>
    %c0_156 = arith.constant 0 : index
    %c0_157 = arith.constant 0 : index
    %c0_158 = arith.constant 0 : index
    %259 = vector.load %arg9[%c0_156, %c0_157, %c0_158] : memref<1x1x32xf32, #tpu.memory_space<vmem>>, vector<1x1x32xf32>
    %260 = vector.shape_cast %259 : vector<1x1x32xf32> to vector<1x32xf32>
    %261 = vector.broadcast %260 : vector<1x32xf32> to vector<16x32xf32>
    %262 = arith.addf %258, %261 : vector<16x32xf32>
    %263 = arith.addf %4, %262 : vector<16x32xf32>
    %c0_159 = arith.constant 0 : index
    %c0_160 = arith.constant 0 : index
    %c0_161 = arith.constant 0 : index
    %264 = vector.load %arg10[%c0_159, %c0_160, %c0_161] : memref<1x1x32xf32, #tpu.memory_space<vmem>>, vector<1x1x32xf32>
    %265 = vector.shape_cast %264 : vector<1x1x32xf32> to vector<1x32xf32>
    %c0_162 = arith.constant 0 : index
    %c0_163 = arith.constant 0 : index
    %c0_164 = arith.constant 0 : index
    %266 = vector.load %arg11[%c0_162, %c0_163, %c0_164] : memref<1x1x32xf32, #tpu.memory_space<vmem>>, vector<1x1x32xf32>
    %267 = vector.shape_cast %266 : vector<1x1x32xf32> to vector<1x32xf32>
    %cst_165 = arith.constant dense<0.000000e+00> : vector<16xf32>
    %268 = vector.multi_reduction <add>, %263, %cst_165 [1] : vector<16x32xf32> to vector<16xf32>
    %269 = vector.shape_cast %268 : vector<16xf32> to vector<16x1xf32>
    %cst_166 = arith.constant 3.200000e+01 : f32
    %270 = vector.broadcast %cst_166 : f32 to vector<16x1xf32>
    %271 = arith.divf %269, %270 : vector<16x1xf32>
    %272 = vector.broadcast %271 : vector<16x1xf32> to vector<16x32xf32>
    %273 = arith.subf %263, %272 : vector<16x32xf32>
    %274 = arith.mulf %273, %273 : vector<16x32xf32>
    %cst_167 = arith.constant dense<0.000000e+00> : vector<16xf32>
    %275 = vector.multi_reduction <add>, %274, %cst_167 [1] : vector<16x32xf32> to vector<16xf32>
    %276 = vector.shape_cast %275 : vector<16xf32> to vector<16x1xf32>
    %cst_168 = arith.constant 3.200000e+01 : f32
    %277 = vector.broadcast %cst_168 : f32 to vector<16x1xf32>
    %278 = arith.divf %276, %277 : vector<16x1xf32>
    %cst_169 = arith.constant 9.99999974E-6 : f32
    %279 = vector.broadcast %cst_169 : f32 to vector<16x1xf32>
    %280 = arith.addf %278, %279 : vector<16x1xf32>
    %281 = math.rsqrt %280 : vector<16x1xf32>
    %282 = vector.broadcast %281 : vector<16x1xf32> to vector<16x32xf32>
    %283 = arith.mulf %273, %282 : vector<16x32xf32>
    %284 = vector.broadcast %265 : vector<1x32xf32> to vector<16x32xf32>
    %285 = arith.mulf %283, %284 : vector<16x32xf32>
    %286 = vector.broadcast %267 : vector<1x32xf32> to vector<16x32xf32>
    %287 = arith.addf %285, %286 : vector<16x32xf32>
    %288 = arith.truncf %287 : vector<16x32xf32> to vector<16x32xbf16>
    %c0_170 = arith.constant 0 : index
    %c0_171 = arith.constant 0 : index
    %c0_172 = arith.constant 0 : index
    %289 = vector.load %arg12[%c0_170, %c0_171, %c0_172] : memref<1x32x128xbf16, #tpu.memory_space<vmem>>, vector<1x32x128xbf16>
    %290 = vector.shape_cast %289 : vector<1x32x128xbf16> to vector<32x128xbf16>
    %cst_173 = arith.constant dense<0.000000e+00> : vector<16x128xf32>
    %291 = tpu.matmul %288, %290, %cst_173 {dimension_numbers = #tpu.dot_dimension_numbers<[1], [0], [0], [1], [0, 0, 1, 1], [], []>} : vector<16x32xbf16>, vector<32x128xbf16>, vector<16x128xf32> -> vector<16x128xf32>
    %c0_174 = arith.constant 0 : index
    %c0_175 = arith.constant 0 : index
    %c0_176 = arith.constant 0 : index
    %292 = vector.load %arg13[%c0_174, %c0_175, %c0_176] : memref<1x1x128xf32, #tpu.memory_space<vmem>>, vector<1x1x128xf32>
    %293 = vector.shape_cast %292 : vector<1x1x128xf32> to vector<1x128xf32>
    %294 = vector.broadcast %293 : vector<1x128xf32> to vector<16x128xf32>
    %295 = arith.addf %291, %294 : vector<16x128xf32>
    %cst_177 = arith.constant 1.702000e+00 : f32
    %296 = vector.broadcast %cst_177 : f32 to vector<16x128xf32>
    %297 = arith.mulf %296, %295 : vector<16x128xf32>
    %298 = arith.negf %297 : vector<16x128xf32>
    %299 = math.exp %298 : vector<16x128xf32>
    %cst_178 = arith.constant 1.000000e+00 : f32
    %300 = vector.broadcast %cst_178 : f32 to vector<16x128xf32>
    %301 = arith.addf %300, %299 : vector<16x128xf32>
    %302 = arith.divf %300, %301 : vector<16x128xf32>
    %303 = arith.mulf %295, %302 : vector<16x128xf32>
    %304 = arith.truncf %303 : vector<16x128xf32> to vector<16x128xbf16>
    %c0_179 = arith.constant 0 : index
    %c0_180 = arith.constant 0 : index
    %c0_181 = arith.constant 0 : index
    %305 = vector.load %arg14[%c0_179, %c0_180, %c0_181] : memref<1x128x32xbf16, #tpu.memory_space<vmem>>, vector<1x128x32xbf16>
    %306 = vector.shape_cast %305 : vector<1x128x32xbf16> to vector<128x32xbf16>
    %cst_182 = arith.constant dense<0.000000e+00> : vector<16x32xf32>
    %307 = tpu.matmul %304, %306, %cst_182 {dimension_numbers = #tpu.dot_dimension_numbers<[1], [0], [0], [1], [0, 0, 1, 1], [], []>} : vector<16x128xbf16>, vector<128x32xbf16>, vector<16x32xf32> -> vector<16x32xf32>
    %c0_183 = arith.constant 0 : index
    %c0_184 = arith.constant 0 : index
    %c0_185 = arith.constant 0 : index
    %308 = vector.load %arg15[%c0_183, %c0_184, %c0_185] : memref<1x1x32xf32, #tpu.memory_space<vmem>>, vector<1x1x32xf32>
    %309 = vector.shape_cast %308 : vector<1x1x32xf32> to vector<1x32xf32>
    %310 = vector.broadcast %309 : vector<1x32xf32> to vector<16x32xf32>
    %311 = arith.addf %307, %310 : vector<16x32xf32>
    %312 = arith.addf %263, %311 : vector<16x32xf32>
    %313 = vector.shape_cast %312 : vector<16x32xf32> to vector<2x8x32xf32>
    %c0_186 = arith.constant 0 : index
    %c0_187 = arith.constant 0 : index
    %c0_188 = arith.constant 0 : index
    %314 = vector.load %arg16[%c0_186, %c0_187, %c0_188] : memref<2x8x32xf32, #tpu.memory_space<vmem>>, vector<2x8x32xf32>
    tpu.vector_store %arg16[%c0_186, %c0_187, %c0_188], %313 {strides = array<i32>} : memref<2x8x32xf32, #tpu.memory_space<vmem>>, vector<2x8x32xf32>,
    return
  }
  func.func @transform_0(%arg0: i32, %arg1: i32) -> (i32, i32, i32) {
    %c0_i32 = arith.constant 0 : i32
    %c0_i32_0 = arith.constant 0 : i32
    %c0_i32_1 = arith.constant 0 : i32
    return %arg0, %c0_i32, %c0_i32_0 : i32, i32, i32
  }
  func.func @transform_1(%arg0: i32, %arg1: i32) -> (i32, i32) {
    %c0_i32 = arith.constant 0 : i32
    %c0_i32_0 = arith.constant 0 : i32
    %c0_i32_1 = arith.constant 0 : i32
    return %c0_i32, %c0_i32_0 : i32, i32
  }
  func.func @transform_2(%arg0: i32, %arg1: i32) -> (i32, i32, i32) {
    %c0_i32 = arith.constant 0 : i32
    %c0_i32_0 = arith.constant 0 : i32
    %c0_i32_1 = arith.constant 0 : i32
    return %arg1, %c0_i32, %c0_i32_0 : i32, i32, i32
  }
  func.func @transform_3(%arg0: i32, %arg1: i32) -> (i32, i32, i32) {
    %c0_i32 = arith.constant 0 : i32
    %c0_i32_0 = arith.constant 0 : i32
    %c0_i32_1 = arith.constant 0 : i32
    return %arg1, %c0_i32, %c0_i32_0 : i32, i32, i32
  }
  func.func @transform_4(%arg0: i32, %arg1: i32) -> (i32, i32, i32) {
    %c0_i32 = arith.constant 0 : i32
    %c0_i32_0 = arith.constant 0 : i32
    %c0_i32_1 = arith.constant 0 : i32
    return %arg1, %c0_i32, %c0_i32_0 : i32, i32, i32
  }
  func.func @transform_5(%arg0: i32, %arg1: i32) -> (i32, i32, i32) {
    %c0_i32 = arith.constant 0 : i32
    %c0_i32_0 = arith.constant 0 : i32
    %c0_i32_1 = arith.constant 0 : i32
    return %arg1, %c0_i32, %c0_i32_0 : i32, i32, i32
  }
  func.func @transform_6(%arg0: i32, %arg1: i32) -> (i32, i32, i32) {
    %c0_i32 = arith.constant 0 : i32
    %c0_i32_0 = arith.constant 0 : i32
    %c0_i32_1 = arith.constant 0 : i32
    return %arg1, %c0_i32, %c0_i32_0 : i32, i32, i32
  }
  func.func @transform_7(%arg0: i32, %arg1: i32) -> (i32, i32, i32) {
    %c0_i32 = arith.constant 0 : i32
    %c0_i32_0 = arith.constant 0 : i32
    %c0_i32_1 = arith.constant 0 : i32
    return %arg1, %c0_i32, %c0_i32_0 : i32, i32, i32
  }
  func.func @transform_8(%arg0: i32, %arg1: i32) -> (i32, i32, i32) {
    %c0_i32 = arith.constant 0 : i32
    %c0_i32_0 = arith.constant 0 : i32
    %c0_i32_1 = arith.constant 0 : i32
    return %arg1, %c0_i32, %c0_i32_0 : i32, i32, i32
  }
  func.func @transform_9(%arg0: i32, %arg1: i32) -> (i32, i32, i32) {
    %c0_i32 = arith.constant 0 : i32
    %c0_i32_0 = arith.constant 0 : i32
    %c0_i32_1 = arith.constant 0 : i32
    return %arg1, %c0_i32, %c0_i32_0 : i32, i32, i32
  }
  func.func @transform_10(%arg0: i32, %arg1: i32) -> (i32, i32, i32) {
    %c0_i32 = arith.constant 0 : i32
    %c0_i32_0 = arith.constant 0 : i32
    %c0_i32_1 = arith.constant 0 : i32
    return %arg1, %c0_i32, %c0_i32_0 : i32, i32, i32
  }
  func.func @transform_11(%arg0: i32, %arg1: i32) -> (i32, i32, i32) {
    %c0_i32 = arith.constant 0 : i32
    %c0_i32_0 = arith.constant 0 : i32
    %c0_i32_1 = arith.constant 0 : i32
    return %arg1, %c0_i32, %c0_i32_0 : i32, i32, i32
  }
  func.func @transform_12(%arg0: i32, %arg1: i32) -> (i32, i32, i32) {
    %c0_i32 = arith.constant 0 : i32
    %c0_i32_0 = arith.constant 0 : i32
    %c0_i32_1 = arith.constant 0 : i32
    return %arg1, %c0_i32, %c0_i32_0 : i32, i32, i32
  }
  func.func @transform_13(%arg0: i32, %arg1: i32) -> (i32, i32, i32) {
    %c0_i32 = arith.constant 0 : i32
    %c0_i32_0 = arith.constant 0 : i32
    %c0_i32_1 = arith.constant 0 : i32
    return %arg1, %c0_i32, %c0_i32_0 : i32, i32, i32
  }
  func.func @transform_14(%arg0: i32, %arg1: i32) -> (i32, i32, i32) {
    %c0_i32 = arith.constant 0 : i32
    %c0_i32_0 = arith.constant 0 : i32
    %c0_i32_1 = arith.constant 0 : i32
    return %arg0, %c0_i32, %c0_i32_0 : i32, i32, i32
  }
}

</mosaic_0001>

<bundles_post_ra>
// kernel: tpu_custom_call.1
= control target key start
LH: loop header
LB: loop body
LE: loop exit
PB: predicated region body
PF: predicated region fallthrough
CT: control target
= control target key end

     0   :  { %s2485_s0 = inlined_call_operand.vmem [shape: f32[2,8,32], index: 0, kind: input, shape index: {}]   ;;  %s2486_s1 = inlined_call_operand.vmem [shape: f32[8,32], index: 1, kind: input, shape index: {}]   ;;  %s2487_s2 = inlined_call_operand.vmem [shape: f32[2,1,32], index: 2, kind: input, shape index: {}]   ;;  %s2488_s3 = inlined_call_operand.vmem [shape: f32[2,1,32], index: 3, kind: input, shape index: {}]   ;;  %s2489_s4 = inlined_call_operand.vmem [shape: bf16[2,32,96], index: 4, kind: input, shape index: {}]   ;;  %s2490_s5 = inlined_call_operand.vmem [shape: f32[2,1,96], index: 5, kind: input, shape index: {}]   ;;  %s2491_s6 = inlined_call_operand.vmem [shape: bf16[2,32,32], index: 6, kind: input, shape index: {}]   ;;  %s2492_s7 = inlined_call_operand.vmem [shape: f32[2,1,32], index: 7, kind: input, shape index: {}]   ;;  %s2493_s8 = inlined_call_operand.vmem [shape: f32[2,1,32], index: 8, kind: input, shape index: {}]   ;;  %s2494_s9 = inlined_call_operand.vmem [shape: f32[2,1,32], index: 9, kind: input, shape index: {}]   ;;  %s2495_s10 = inlined_call_operand.vmem [shape: bf16[2,32,128], index: 10, kind: input, shape index: {}]   ;;  %s2496_s11 = inlined_call_operand.vmem [shape: f32[2,1,128], index: 11, kind: input, shape index: {}]   ;;  %s2497_s12 = inlined_call_operand.vmem [shape: bf16[2,128,32], index: 12, kind: input, shape index: {}]   ;;  %s2498_s13 = inlined_call_operand.vmem [shape: f32[2,1,32], index: 13, kind: input, shape index: {}]   ;;  %s2499_s14 = inlined_call_operand.hbm [shape: f32[2,8,32], index: 14, kind: output, shape index: {}]  }
   0x1   :  { %2503 = sst [smem:[#allocation11_spill]] %s2488_s3 }
   0x2   :  { %2504 = sst [smem:[#allocation12_spill]] %s2489_s4 }
   0x3   :  { %2505 = sst [smem:[#allocation13_spill]] %s2491_s6 }
   0x4   :  { %2506 = sst [smem:[#allocation14_spill]] %s2499_s14 }
   0x5   :  { %19 = vsyncpa [#allocation5], 0  ;;  %s2163_s29 = smov 0   ;;  %s2165_s30 = smov 0  }
   0x6   :  { %s2167_s15 = smov 0  }
   0x7 LB: > { %2507 = sst [smem:[#allocation7_spill]] %s2064_s30  ;;  %s34_s17 = sadd.s32 1, %s2064_s30  ;;  %s2068_s15 = sphi %s2167_s15, %s25_s15   ;;  %s2064_s30 = sphi %s2165_s30, %s2525_s30   ;;  %s2060_s29 = sphi %s2163_s29, %s2524_s29  }
   0x8   : > { %2508 = sst [smem:[#allocation8_spill]] %s2068_s15  ;;  %p35_p0 = scmp.ge.s32.totalorder %s34_s17, 2 }
   0x9   : > { %p1794_p1 = scmp.ge.s32.totalorder %s2068_s15, 1  ;;  %p530_p2 = scmp.lt.s32.totalorder %s2068_s15, 3 }
   0xa   : > { %s2527_s17 = smov (%p35_p0, %s34_s17), 0 }
   0xb   : > { %2509 = sst [smem:[#allocation9_spill]] %s2527_s17  ;;  %p531_p3 = pnand %p1794_p1, %p530_p2 }
   0xd   : > { %534 = sbr.rel (%p531_p3) target bundleno = 2407 (0x967), region = 76 }
  0x12   : > { %p621_p4 = scmp.lt.s32.totalorder %s2060_s29, 1  ;;  %s2511_s4 = sld [smem:[#allocation12_spill]] }
  0x13   : > { %s2512_s6 = sld [smem:[#allocation13_spill]]  ;;  %p1803_p5 = scmp.ne.s32.totalorder %s2060_s29, 0 }
  0x14   : > { %s2182_s18 = scalar_select %p621_p4, %s2060_s29, 1 }
  0x16   : > { %s1889_s25 = sshll.u32 %s2182_s18, 4  ;;  %s645_s3 = scalar_lea.vmem %s2493_s8, %s2182_s18 }
  0x17   : > { %s648_s28 = scalar_lea.vmem %s2494_s9, %s2182_s18  ;;  %s664_s26 = scalar_lea.vmem %s2498_s13, %s2182_s18 }
  0x18   : > { %s2200_s16 = scalar_lea.vmem %s2511_s4, %s1889_s25  ;;  %s2222_s4 = scalar_lea.vmem %s2495_s10, %s1889_s25 }
  0x19   : > { %s2205_s14 = scalar_lea.vmem %s2512_s6, %s1889_s25  ;;  %s656_s6 = scalar_lea.vmem %s2496_s11, %s2182_s18 }
  0x1a   : > { %2513 = sst [smem:[#allocation10_spill]] %s2205_s14  ;;  %s1892_s14 = sshll.u32 %s2182_s18, 6 }
  0x1b   : > { %s2232_s22 = scalar_lea.vmem %s2497_s12, %s1892_s14  ;;  %670 = sbr.rel (%p1803_p5) target bundleno = 38 (0x26), region = 80 }
  0x20   : > { %v671_v0 = vld [vmem:[%s2485_s0] sm:$0xff]  ;;  %vm676_vm0 = vcmask 261120   ;;  %v672_v2 = vld [vmem:[%s2485_s0 + $0x8] sm:$0xff] }
  0x21   : > { %v673_v1 = vld [vmem:[%s2486_s1] sm:$0xff] }
  0x22   : > { %v674_v3 = vadd.f32 %v673_v1, %v671_v0  ;;  %v675_v4 = vadd.f32 %v673_v1, %v672_v2 }
  0x24   : > { %677 = vst.msk [vmem:[#allocation4] sm:$0xff] %vm676_vm0, %v674_v3 }
  0x25   : > { %678 = vst.msk [vmem:[#allocation4 + $0x8] sm:$0xff] %vm676_vm0, %v675_v4 }
  0x26 PF: > { %vm689_vm1 = vcmask 261120   ;;  %v2070_v9 = vmov 32.0   ;;  %v1894_v26 = vld [vmem:[%s2200_s16 + $0x8] sm:$0xff]  ;;  %v1893_v28 = vld [vmem:[%s2200_s16] sm:$0xff]  ;;  %s2514_s16 = scalar_lea.vmem %s2487_s2, %s2182_s18  ;;  %s2515_s24 = sld [smem:[#allocation11_spill]]  ;;  %vm791_vm9 = vcmask 781312  }
  0x27   : > { %1964 = vrcp.f32 %v2070_v9  ;;  %781 = vmatpush.bf16.msra.mxu0 %v1894_v26  ;;  %v1956_v47 = vld [vmem:[%s2514_s16] ss:$0 sm:$0xff]  ;;  %s2517_s25 = scalar_lea.vmem %s2490_s5, %s2182_s18  ;;  %s2071_s20 = smov 64   ;;  %vm800_vm10 = vcmask 64512   ;;  %vm839_vm11 = vcmask 1043456   ;;  %v681_v26 = vlaneseq }
  0x28   : > { %v1958_v57 = vld [vmem:[%s2517_s25] ss:$0 sm:$0xff]  ;;  %s2072_s30 = smov 96   ;;  %s2073_s17 = smov 88   ;;  %vm857_vm13 = vcmask 60416   ;;  %vm926_vm14 = vcmask 126016  }
  0x29   : > { %s2074_s14 = smov 120   ;;  %s2075_s29 = smov 104   ;;  %vm995_vm15 = vcmask 191616   ;;  %vm1064_vm0 = vcmask 257216  }
  0x2a   : > { %s2076_s16 = smov 112   ;;  %s2078_s15 = smov 80  }
  0x2b   : > { %v2247_v5 = vld [vmem:[#allocation4] sm:$0xff]  ;;  %782 = vmatpush.bf16.msra.mxu0 %v1893_v28  ;;  %v684_v28 = vand.u32 127, %v681_v26  ;;  %s2079_s21 = smov 72   ;;  %s2082_s27 = smov 40  }
  0x2c   : > { %v690_v6 = vsel %vm689_vm1, %v2247_v5, 0.0  ;;  %v2251_v7 = vld [vmem:[#allocation4 + $0x8] sm:$0xff]  ;;  %s2516_s23 = scalar_lea.vmem %s2515_s24, %s2182_s18  ;;  %s2080_s24 = smov 48  }
  0x2d   : > { %691 = vadd.xlane.f32.xlu0 %v690_v6  ;;  %v693_v8 = vsel %vm689_vm1, %v2251_v7, 0.0  ;;  %v1965_v10 = vpop.eup %1964  ;;  %v1957_v52 = vld [vmem:[%s2516_s23] ss:$0 sm:$0xff]  ;;  %s2081_s23 = smov 56   ;;  %s2083_s19 = smov 8  }
  0x2e   : > { %v697_v11 = vmul.f32 32.0, %v1965_v10  ;;  %vm701_vm2 = vweird.f32 %v1965_v10  ;;  %s2084_s25 = smov 16  }
  0x30   : > { %v698_v12 = vsub.f32 1.0, %v697_v11 }
  0x32   : > { %v699_v13 = vmul.f32 %v1965_v10, %v698_v12 }
  0x34   : > { %v700_v14 = vadd.f32 %v1965_v10, %v699_v13 }
  0x35   : > { %694 = vadd.xlane.f32.xlu0 %v693_v8 }
  0x36   : > { %v2255_v15 = vsel %vm701_vm2, %v1965_v10, %v700_v14 }
  0xa0   : > { %v692_v16 = vpop.xlane.xlu0 %691 }
  0xa1   : > { %v703_v17 = vmul.f32 %v2255_v15, %v692_v16 }
  0xa3   : > { %v705_v18 = vsub.f32 %v2247_v5, %v703_v17 }
  0xa5   : > { %v707_v19 = vmul.f32 %v705_v18, %v705_v18 }
  0xa7   : > { %v709_v20 = vsel %vm689_vm1, %v707_v19, 0.0 }
  0xa8   : > { %710 = vadd.xlane.f32.xlu1 %v709_v20  ;;  %v695_v21 = vpop.xlane.xlu0 %694 }
  0xa9   : > { %v704_v22 = vmul.f32 %v2255_v15, %v695_v21 }
  0xab   : > { %v706_v23 = vsub.f32 %v2251_v7, %v704_v22 }
  0xad   : > { %v708_v24 = vmul.f32 %v706_v23, %v706_v23 }
  0xaf   : > { %v712_v25 = vsel %vm689_vm1, %v708_v24, 0.0 }
  0xb0   : > { %713 = vadd.xlane.f32.xlu1 %v712_v25 }
 0x11b   : > { %v711_v27 = vpop.xlane.xlu1 %710 }
 0x11c   : > { %v715_v29 = vmul.f32 %v711_v27, %v2255_v15  ;;  %v682_v27 = vshrl.u32 %v681_v26, 7 }
 0x11e   : > { %v717_v30 = vadd.f32 1e-05, %v715_v29  ;;  %vm685_vm12 = vcmp.gt.s32.totalorder %v684_v28, %v682_v27 }
 0x120   : > { %1966 = vrsqrt.f32 %v717_v30  ;;  %vm725_vm4 = vweird.f32 %v717_v30 }
 0x123   : > { %v714_v31 = vpop.xlane.xlu1 %713 }
 0x124   : > { %v716_v32 = vmul.f32 %v714_v31, %v2255_v15 }
 0x126   : > { %v1967_v33 = vpop.eup %1966  ;;  %v718_v34 = vadd.f32 1e-05, %v716_v32 }
 0x127   : > { %v720_v35 = vmul.f32 %v1967_v33, %v717_v30  ;;  %vm726_vm3 = vweird.f32 %v1967_v33  ;;  %v2077_v30 = vmov 0.0  }
 0x128   : > { %1968 = vrsqrt.f32 %v718_v34  ;;  %vm727_vm5 = vmor %vm725_vm4, %vm726_vm3  ;;  %vm735_vm7 = vweird.f32 %v718_v34  ;;  %v2310_v31 = vsel %vm685_vm12, -1e+09, %v2077_v30 }
 0x129   : > { %v721_v36 = vmul.f32 %v1967_v33, %v720_v35 }
 0x12b   : > { %v722_v37 = vmul.f32 0.5, %v721_v36 }
 0x12d   : > { %v723_v38 = vsub.f32 1.5, %v722_v37 }
 0x12e   : > { %v1969_v39 = vpop.eup %1968 }
 0x12f   : > { %v724_v40 = vmul.f32 %v1967_v33, %v723_v38  ;;  %v730_v41 = vmul.f32 %v1969_v39, %v718_v34  ;;  %vm736_vm6 = vweird.f32 %v1969_v39 }
 0x130   : > { %vm737_vm8 = vmor %vm735_vm7, %vm736_vm6 }
 0x131   : > { %v731_v42 = vmul.f32 %v1969_v39, %v730_v41  ;;  %v728_v43 = vsel %vm727_vm5, %v1967_v33, %v724_v40 }
 0x132   : > { %v739_v46 = vmul.f32 %v728_v43, %v705_v18 }
 0x133   : > { %v732_v44 = vmul.f32 0.5, %v731_v42 }
 0x134   : > { %v744_v51 = vmul.f32 %v1956_v47, %v739_v46 }
 0x135   : > { %v733_v45 = vsub.f32 1.5, %v732_v44 }
 0x136   : > { %v749_v54 = vadd.f32 %v1957_v52, %v744_v51 }
 0x137   : > { %v734_v48 = vmul.f32 %v1969_v39, %v733_v45 }
 0x139   : > { %v738_v49 = vsel %vm737_vm8, %v1969_v39, %v734_v48 }
 0x13a   : > { %v740_v50 = vmul.f32 %v738_v49, %v706_v23 }
 0x13c   : > { %v745_v53 = vmul.f32 %v1956_v47, %v740_v50 }
 0x13e   : > { %v750_v55 = vadd.f32 %v1957_v52, %v745_v53 }
 0x140   : > { %v751_v56 = vpack.c.bf16 %v750_v55, %v749_v54 }
 0x142   : > { %1812 = vmatmul.msk.bf16.vlgmr.msra.gmra.mxu0 %vm689_vm1, %v751_v56 }
 0x1bf   : > { %v784_v58 = vpop.f32.mrf.mxu0 }
 0x1c0   : > { %v785_v59 = vadd.f32 %v1958_v57, %v784_v58 }
 0x1c2   : > { %v789_v60 = vpack.c.bf16 %v785_v59, %v785_v59 }
 0x1c4   : > { %792 = vst.msk [vmem:[#allocation2] sm:$0xf] %vm791_vm9, %v789_v60 }
 0x1c7   : > { %v786_v61 = vpop.f32.mrf.mxu0 }
 0x1c8   : > { %v787_v62 = vadd.f32 %v1958_v57, %v786_v61 }
 0x1ca   : > { %v790_v63 = vpack.c.bf16 %v787_v62, %v787_v62 }
 0x1cb   : > { %v794_v0 = vld [vmem:[#allocation2] sm:$0xf] }
 0x1cc   : > { %793 = vst.msk [vmem:[#allocation2 + $0x4] sm:$0xf] %vm791_vm9, %v790_v63  ;;  %v796_v1 = vunpack.c.l.b16 %v794_v0 }
 0x1ce   : > { %v797_v2 = vpack.c.b16 %v796_v1, %v796_v1 }
 0x1d0   : > { %834 = vrot.lane.b32.xlu1 %v797_v2, %s2071_s20  ;;  %798 = vrot.lane.b32.xlu2 %v797_v2, %s2072_s30 }
 0x1d3   : > { %v859_v3 = vld [vmem:[#allocation2] sm:$0xff]  }
 0x1d4   : > { %v861_v4 = vunpack.c.l.b16 %v859_v3  ;;  %v997_v8 = vld [vmem:[#allocation2] sm:$0xff]   ;;  %v1268_v18 = vunpack.c.h.b16 %v859_v3 }
 0x1d5   : > { %v999_v9 = vunpack.c.l.b16 %v997_v8  ;;  %v2292_v11 = vld [vmem:[#allocation2] sm:$0xff]   ;;  %v1200_v36 = vunpack.c.h.b16 %v997_v8 }
 0x1d6   : > { %v2284_v6 = vpack.c.b16 %v861_v4, %v861_v4  ;;  %v930_v12 = vunpack.c.l.b16 %v2292_v11  ;;  %v1067_v14 = vld [vmem:[#allocation2 + $0x4] sm:$0xf]  ;;  %v2303_v19 = vpack.c.b16 %v1268_v18, %v1268_v18  ;;  %v1132_v52 = vunpack.c.h.b16 %v2292_v11 }
 0x1d7   : > { %v2290_v10 = vpack.c.b16 %v999_v9, %v999_v9  ;;  %v1069_v16 = vunpack.c.l.b16 %v1067_v14  ;;  %v2315_v37 = vpack.c.b16 %v1200_v36, %v1200_v36 }
 0x1d8   : > { %865 = vrot.lane.b32.xlu0 %v2284_v6, %s2073_s17  ;;  %863 = vrot.lane.b32.xlu1 %v2284_v6, %s2074_s14  ;;  %v2296_v13 = vpack.c.b16 %v930_v12, %v930_v12  ;;  %v2326_v53 = vpack.c.b16 %v1132_v52, %v1132_v52 }
 0x1d9   : > { %v2300_v17 = vpack.c.b16 %v1069_v16, %v1069_v16 }
 0x1e0   : > { %1001 = vrot.lane.b32.xlu1 %v2290_v10, %s2075_s29 }
 0x1e8   : > { %932 = vrot.lane.b32.xlu1 %v2296_v13, %s2076_s16 }
 0x1f0   : > { %1071 = vrot.lane.b32.xlu1 %v2300_v17, %s2072_s30  ;;  %s2518_s30 = sld [smem:[#allocation10_spill]] }
 0x1f8   : > { %1270 = vrot.lane.b32.xlu1 %v2303_v19, %s2075_s29  ;;  %s2519_s29 = scalar_lea.vmem %s2492_s7, %s2182_s18  ;;  %s2087_s18 = smov 128  }
 0x22a   : > { %v799_v20 = vpop.permute.xlu2 %798 }
 0x22b   : > { %v805_v21 = vsel %vm800_vm10, %v799_v20, 0 }
 0x22c   : > { %814 = vmatpush.bf16.xpose.msra.mxu1 %v805_v21 }
 0x233   : > { %1813 = vmatmul.msk.bf16.vlgmr.msra.gmra.mxu1 %vm800_vm10, %v794_v0 }
 0x242   : > { %v835_v22 = vpop.permute.xlu1 %834 }
 0x243   : > { %v841_v23 = vsel %vm839_vm11, %v835_v22, 0 }
 0x244   : > { %850 = vmatpush.bf16.msra.mxu2 %v841_v23 }
 0x24a   : > { %v866_v24 = vpop.permute.xlu0 %865  ;;  %v864_v38 = vpop.permute.xlu1 %863 }
 0x24b   : > { %v871_v25 = vsel %vm800_vm10, %v866_v24, 0 }
 0x24c   : > { %880 = vmatpush.bf16.xpose.msrb.mxu2 %v871_v25 }
 0x252   : > { %v1002_v39 = vpop.permute.xlu1 %1001 }
 0x25a   : > { %v933_v40 = vpop.permute.xlu1 %932 }
 0x262   : > { %v1072_v44 = vpop.permute.xlu1 %1071 }
 0x263   : > { %v1077_v47 = vsel %vm800_vm10, %v1072_v44, 0 }
 0x2b0   : > { %v816_v29 = vpop.f32.mrf.mxu1 }
 0x2b1   : > { %v820_v32 = vmul.f32 0.35355338, %v816_v29 }
 0x2b3   : > { %v821_v33 = vadd.f32 %v820_v32, %v2310_v31 }
 0x2b5   : > { %v822_v34 = vsel %vm800_vm10, %v821_v33, -inf }
 0x2b6   : > { %823 = vmax.xlane.f32.xlu2 %v822_v34 }
 0x2b8   : > { %v818_v35 = vpop.f32.mrf.mxu1 }
 0x2ce   : > { %934 = vrot.lane.b32.xlu2 %v2296_v13, %s2078_s15 }
 0x2d6   : > { %1204 = vrot.lane.b32.xlu2 %v2315_v37, %s2078_s15 }
 0x329   : > { %v824_v41 = vpop.xlane.xlu2 %823 }
 0x32a   : > { %v825_v42 = vsub.f32 %v821_v33, %v824_v41 }
 0x32c   : > { %v826_v43 = vmul.f32 1.442695, %v825_v42 }
 0x32e   : > { %1970 = vpow2.f32 %v826_v43 }
 0x331   : > { %v935_v45 = vpop.permute.xlu2 %934 }
 0x332   : > { %v940_v46 = vsel %vm800_vm10, %v935_v45, 0 }
 0x333   : > { %949 = vmatpush.bf16.xpose.msrb.mxu0 %v940_v46 }
 0x334   : > { %v1971_v48 = vpop.eup %1970 }
 0x335   : > { %v828_v49 = vsel %vm800_vm10, %v1971_v48, 0.0 }
 0x336   : > { %829 = vadd.xlane.f32.xlu0 %v828_v49 }
 0x339   : > { %v1205_v50 = vpop.permute.xlu2 %1204 }
 0x33a   : > { %v1210_v51 = vsel %vm800_vm10, %v1205_v50, 0  ;;  %1817 = vmatmul.msk.bf16.vlgmr.msrb.gmra.mxu0 %vm800_vm10, %v933_v40 }
 0x33b   : > { %1086 = vmatpush.bf16.xpose.msra.mxu0 %v1077_v47 }
 0x343   : > { %1219 = vmatpush.bf16.xpose.msrb.mxu0 %v1210_v51 }
 0x34a   : > { %1003 = vrot.lane.b32.xlu0 %v2290_v10, %s2079_s21  ;;  %1821 = vmatmul.msk.bf16.vlgmr.msra.gmra.mxu0 %vm800_vm10, %v1067_v14  ;;  %v1271_v14 = vpop.permute.xlu1 %1270 }
 0x352   : > { %1136 = vrot.lane.b32.xlu0 %v2326_v53, %s2073_s17 }
 0x35a   : > { %1134 = vrot.lane.b32.xlu0 %v2326_v53, %s2074_s14 }
 0x362   : > { %1272 = vrot.lane.b32.xlu0 %v2303_v19, %s2079_s21 }
 0x36a   : > { %1202 = vrot.lane.b32.xlu0 %v2315_v37, %s2076_s16 }
 0x3a9   : > { %v830_v54 = vpop.xlane.xlu0 %829 }
 0x3aa   : > { %1972 = vrcp.f32 %v830_v54 }
 0x3b0   : > { %v1973_v55 = vpop.eup %1972 }
 0x3b1   : > { %v832_v56 = vmul.f32 %v1973_v55, %v1971_v48 }
 0x3b3   : > { %v833_v57 = vpack.c.bf16 %v832_v56, %v832_v56 }
 0x3b5   : > { %1814 = vmatmul.msk.bf16.vlgmr.msra.gmra.mxu2 %vm800_vm10, %v833_v57 }
 0x3b7   : > { %v951_v58 = vpop.f32.mrf.mxu0 }
 0x3b8   : > { %v955_v59 = vmul.f32 0.35355338, %v951_v58 }
 0x3ba   : > { %v956_v60 = vadd.f32 %v955_v59, %v2310_v31 }
 0x3bc   : > { %v1004_v61 = vpop.permute.xlu0 %1003  ;;  %v957_v62 = vsel %vm800_vm10, %v956_v60, -inf }
 0x3bd   : > { %958 = vmax.xlane.f32.xlu0 %v957_v62  ;;  %v1009_v63 = vsel %vm800_vm10, %v1004_v61, 0 }
 0x3be   : > { %1018 = vmatpush.bf16.xpose.msra.mxu3 %v1009_v63 }
 0x3bf   : > { %v953_v0 = vpop.f32.mrf.mxu0 }
 0x3c4   : > { %v1137_v1 = vpop.permute.xlu0 %1136 }
 0x3c5   : > { %1815 = vmatmul.msk.bf16.vlgmr.msrb.gmra.mxu2 %vm800_vm10, %v864_v38  ;;  %1819 = vmatmul.msk.bf16.vlgmr.msra.gmra.mxu3 %vm800_vm10, %v1002_v39  ;;  %v1142_v2 = vsel %vm800_vm10, %v1137_v1, 0 }
 0x3c6   : > { %1151 = vmatpush.bf16.xpose.msrb.mxu3 %v1142_v2 }
 0x3c7   : > { %v1088_v3 = vpop.f32.mrf.mxu0 }
 0x3c8   : > { %v1092_v27 = vmul.f32 0.35355338, %v1088_v3 }
 0x3ca   : > { %v2352_v33 = vadd.f32 %v1092_v27, %v2310_v31 }
 0x3cc   : > { %v1135_v4 = vpop.permute.xlu0 %1134  ;;  %v1094_v35 = vsel %vm800_vm10, %v2352_v33, -inf }
 0x3cf   : > { %v1090_v8 = vpop.f32.mrf.mxu0 }
 0x3d4   : > { %v1273_v9 = vpop.permute.xlu0 %1272 }
 0x3d5   : > { %v1278_v11 = vsel %vm800_vm10, %v1273_v9, 0  ;;  %1823 = vmatmul.msk.bf16.vlgmr.msrb.gmra.mxu3 %vm800_vm10, %v1135_v4 }
 0x3d6   : > { %1287 = vmatpush.bf16.xpose.msra.mxu3 %v1278_v11 }
 0x3dc   : > { %v1203_v12 = vpop.permute.xlu0 %1202 }
 0x3dd   : > { %1825 = vmatmul.msk.bf16.vlgmr.msrb.gmra.mxu0 %vm800_vm10, %v1203_v12 }
 0x3e5   : > { %1827 = vmatmul.msk.bf16.vlgmr.msra.gmra.mxu3 %vm800_vm10, %v1271_v14 }
 0x430   : > { %v959_v34 = vpop.xlane.xlu0 %958 }
 0x431   : > { %v960_v36 = vsub.f32 %v956_v60, %v959_v34 }
 0x433   : > { %v961_v40 = vmul.f32 1.442695, %v960_v36 }
 0x435   : > { %1974 = vpow2.f32 %v961_v40 }
 0x438   : > { %v852_v16 = vpop.f32.mrf.mxu2 }
 0x439   : > { %v856_v18 = vpack.c.bf16 %v852_v16, %v852_v16 }
 0x43b   : > { %858 = vst.msk [vmem:[#allocation3] sm:$0xf] %vm857_vm13, %v856_v18  ;;  %v1975_v49 = vpop.eup %1974 }
 0x43c   : > { %v963_v50 = vsel %vm800_vm10, %v1975_v49, 0.0 }
 0x440   : > { %v854_v20 = vpop.f32.mrf.mxu2 }
 0x448   : > { %v882_v21 = vpop.f32.mrf.mxu2  ;;  %v1020_v22 = vpop.f32.mrf.mxu3 }
 0x449   : > { %v886_v23 = vmul.f32 0.35355338, %v882_v21  ;;  %v1024_v24 = vmul.f32 0.35355338, %v1020_v22 }
 0x44b   : > { %v887_v25 = vadd.f32 %v886_v23, %v2310_v31  ;;  %v1025_v26 = vadd.f32 %v1024_v24, %v2310_v31 }
 0x44d   : > { %v888_v28 = vsel %vm800_vm10, %v887_v25, -inf  ;;  %v1026_v29 = vsel %vm800_vm10, %v1025_v26, -inf }
 0x44e   : > { %889 = vmax.xlane.f32.xlu1 %v888_v28  ;;  %1027 = vmax.xlane.f32.xlu2 %v1026_v29 }
 0x450   : > { %v884_v30 = vpop.f32.mrf.mxu2  ;;  %v1022_v32 = vpop.f32.mrf.mxu3 }
 0x456   : > { %1095 = vmax.xlane.f32.xlu1 %v1094_v35 }
 0x458   : > { %v1153_v38 = vpop.f32.mrf.mxu3 }
 0x459   : > { %v1157_v39 = vmul.f32 0.35355338, %v1153_v38 }
 0x45a   : > { %v1221_v41 = vpop.f32.mrf.mxu0 }
 0x45b   : > { %v1225_v42 = vmul.f32 0.35355338, %v1221_v41  ;;  %v1158_v43 = vadd.f32 %v1157_v39, %v2310_v31 }
 0x45d   : > { %v1159_v44 = vsel %vm800_vm10, %v1158_v43, -inf  ;;  %v1226_v45 = vadd.f32 %v1225_v42, %v2310_v31 }
 0x45e   : > { %1160 = vmax.xlane.f32.xlu2 %v1159_v44 }
 0x45f   : > { %v1227_v46 = vsel %vm800_vm10, %v1226_v45, -inf }
 0x460   : > { %v1155_v47 = vpop.f32.mrf.mxu3  ;;  %1228 = vmax.xlane.f32.xlu1 %v1227_v46 }
 0x462   : > { %v1223_v48 = vpop.f32.mrf.mxu0 }
 0x468   : > { %v1289_v51 = vpop.f32.mrf.mxu3  ;;  %964 = vadd.xlane.f32.xlu1 %v963_v50 }
 0x469   : > { %v1293_v52 = vmul.f32 0.35355338, %v1289_v51 }
 0x46b   : > { %v1294_v54 = vadd.f32 %v1293_v52, %v2310_v31 }
 0x46d   : > { %v1295_v55 = vsel %vm800_vm10, %v1294_v54, -inf }
 0x46e   : > { %1296 = vmax.xlane.f32.xlu0 %v1295_v55 }
 0x470   : > { %v1291_v56 = vpop.f32.mrf.mxu3 }
 0x481   : > { %969 = vrot.lane.b32.xlu1 %v2296_v13, %s2080_s24 }
 0x482   : > { %900 = vrot.lane.b32.xlu0 %v2284_v6, %s2081_s23 }
 0x489   : > { %1171 = vrot.lane.b32.xlu1 %v2326_v53, %s2081_s23  ;;  %s2086_s23 = smov [#allocation4]  }
 0x491   : > { %1106 = vrot.lane.b32.xlu1 %v2300_v17, %s2071_s20  ;;  %s2085_s20 = smov 24  }
 0x4c1   : > { %v890_v57 = vpop.xlane.xlu1 %889  ;;  %v1028_v58 = vpop.xlane.xlu2 %1027 }
 0x4c2   : > { %v1029_v59 = vsub.f32 %v1025_v26, %v1028_v58  ;;  %v891_v60 = vsub.f32 %v887_v25, %v890_v57 }
 0x4c4   : > { %v1030_v31 = vmul.f32 1.442695, %v1029_v59  ;;  %v892_v61 = vmul.f32 1.442695, %v891_v60 }
 0x4c6   : > { %1976 = vpow2.f32 %v1030_v31 }
 0x4c7   : > { %1978 = vpow2.f32 %v892_v61 }
 0x4c9   : > { %v1096_v62 = vpop.xlane.xlu1 %1095 }
 0x4cc   : > { %v2369_v63 = vpop.eup %1976 }
 0x4cd   : > { %v1032_v13 = vsel %vm800_vm10, %v2369_v63, 0.0  ;;  %v1979_v0 = vpop.eup %1978 }
 0x4ce   : > { %1033 = vadd.xlane.f32.xlu2 %v1032_v13  ;;  %v894_v3 = vsel %vm800_vm10, %v1979_v0, 0.0 }
 0x4d1   : > { %v1161_v6 = vpop.xlane.xlu2 %1160 }
 0x4d2   : > { %v1162_v53 = vsub.f32 %v1158_v43, %v1161_v6 }
 0x4d3   : > { %v1229_v1 = vpop.xlane.xlu1 %1228 }
 0x4d4   : > { %v1163_v17 = vmul.f32 1.442695, %v1162_v53  ;;  %v1230_v2 = vsub.f32 %v1226_v45, %v1229_v1 }
 0x4d6   : > { %1980 = vpow2.f32 %v1163_v17  ;;  %895 = vadd.xlane.f32.xlu2 %v894_v3  ;;  %v1231_v4 = vmul.f32 1.442695, %v1230_v2 }
 0x4d8   : > { %1982 = vpow2.f32 %v1231_v4 }
 0x4db   : > { %v965_v20 = vpop.xlane.xlu1 %964 }
 0x4dc   : > { %v2374_v8 = vpop.eup %1980 }
 0x4dd   : > { %v1165_v9 = vsel %vm800_vm10, %v2374_v8, 0.0 }
 0x4de   : > { %1166 = vadd.xlane.f32.xlu0 %v1165_v9  ;;  %v2378_v12 = vpop.eup %1982 }
 0x4df   : > { %v1233_v18 = vsel %vm800_vm10, %v2378_v12, 0.0 }
 0x4e1   : > { %v1297_v11 = vpop.xlane.xlu0 %1296 }
 0x4e2   : > { %v1298_v14 = vsub.f32 %v1294_v54, %v1297_v11 }
 0x4e4   : > { %v1299_v16 = vmul.f32 1.442695, %v1298_v14 }
 0x4e6   : > { %1984 = vpow2.f32 %v1299_v16  ;;  %1234 = vadd.xlane.f32.xlu0 %v1233_v18 }
 0x4e7   : > { %1986 = vrcp.f32 %v965_v20 }
 0x4ec   : > { %v1985_v21 = vpop.eup %1984 }
 0x4ed   : > { %v1301_v22 = vsel %vm800_vm10, %v1985_v21, 0.0  ;;  %v1987_v23 = vpop.eup %1986 }
 0x4ee   : > { %1302 = vadd.xlane.f32.xlu1 %v1301_v22  ;;  %1038 = vrot.lane.b32.xlu2 %v2290_v10, %s2082_s27  ;;  %v967_v24 = vmul.f32 %v1987_v23, %v1975_v49  ;;  %v1097_v10 = vsub.f32 %v2352_v33, %v1096_v62 }
 0x4f0   : > { %v968_v29 = vpack.c.bf16 %v967_v24, %v967_v24  ;;  %v1098_v35 = vmul.f32 1.442695, %v1097_v10 }
 0x4f2   : > { %1988 = vpow2.f32 %v1098_v35 }
 0x4f3   : > { %v970_v25 = vpop.permute.xlu1 %969 }
 0x4f4   : > { %v901_v26 = vpop.permute.xlu0 %900  ;;  %v975_v27 = vsel %vm839_vm11, %v970_v25, 0 }
 0x4f5   : > { %v906_v28 = vsel %vm839_vm11, %v901_v26, 0  ;;  %984 = vmatpush.bf16.msrb.mxu1 %v975_v27 }
 0x4f6   : > { %915 = vmatpush.bf16.msra.mxu2 %v906_v28 }
 0x4f8   : > { %1818 = vmatmul.msk.bf16.vlgmr.msrb.gmra.mxu1 %vm800_vm10, %v968_v29  ;;  %v1989_v36 = vpop.eup %1988 }
 0x4f9   : > { %v1100_v38 = vsel %vm800_vm10, %v1989_v36, 0.0 }
 0x4fa   : > { %1307 = vrot.lane.b32.xlu0 %v2303_v19, %s2082_s27  ;;  %s1611_s27 = sshll.u32 %s2086_s23, 4  ;;  %s1612_s27 = int_to_ptr.vmem [resolvable:$true] %s1611_s27 }
 0x4fb   : > { %v1172_v30 = vpop.permute.xlu1 %1171 }
 0x4fc   : > { %v1177_v33 = vsel %vm839_vm11, %v1172_v30, 0 }
 0x503   : > { %v1107_v32 = vpop.permute.xlu1 %1106 }
 0x504   : > { %v1112_v34 = vsel %vm839_vm11, %v1107_v32, 0  ;;  %v1897_v32 = vld [vmem:[%s2518_s30 + $0x8] sm:$0xff] }
 0x505   : > { %1121 = vmatpush.bf16.msra.mxu1 %v1112_v34  ;;  %1370 = vmatpush.bf16.msra.mxu0 %v1897_v32  ;;  %v1896_v34 = vld [vmem:[%s2518_s30] sm:$0xff]  ;;  %v1902_v32 = vld [vmem:[%s2232_s22 + $0x10] sm:$0xff]  ;;  %s2521_s30 = sld [smem:[#allocation14_spill]] }
 0x509   : > { %1371 = vmatpush.bf16.msra.mxu0 %v1896_v34 }
 0x50b   : > { %s1613_s17 = sshll.u32 %s2521_s30, 4  ;;  %s1614_s17 = int_to_ptr.hbm [resolvable:$true] %s1613_s17 }
 0x517   : > { %1101 = vadd.xlane.f32.xlu2 %v1100_v38 }
 0x52f   : > { %1239 = vrot.lane.b32.xlu2 %v2315_v37, %s2080_s24 }
 0x541   : > { %v1034_v39 = vpop.xlane.xlu2 %1033 }
 0x549   : > { %v896_v40 = vpop.xlane.xlu2 %895 }
 0x54a   : > { %1990 = vrcp.f32 %v896_v40 }
 0x54b   : > { %1992 = vrcp.f32 %v1034_v39  ;;  %v1959_v39 = vld [vmem:[%s2519_s29] ss:$0 sm:$0xff] }
 0x550   : > { %v1991_v19 = vpop.eup %1990 }
 0x551   : > { %v898_v41 = vmul.f32 %v1991_v19, %v1979_v0  ;;  %v1039_v42 = vpop.permute.xlu2 %1038  ;;  %v1167_v45 = vpop.xlane.xlu0 %1166 }
 0x552   : > { %v1044_v43 = vsel %vm839_vm11, %v1039_v42, 0  ;;  %v1993_v46 = vpop.eup %1992  ;;  %1994 = vrcp.f32 %v1167_v45 }
 0x553   : > { %v899_v44 = vpack.c.bf16 %v898_v41, %v898_v41  ;;  %1053 = vmatpush.bf16.msrb.mxu2 %v1044_v43  ;;  %v1036_v37 = vmul.f32 %v1993_v46, %v2369_v63 }
 0x555   : > { %1816 = vmatmul.msk.bf16.vlgmr.msra.gmra.mxu2 %vm800_vm10, %v899_v44  ;;  %v1037_v47 = vpack.c.bf16 %v1036_v37, %v1036_v37 }
 0x557   : > { %1186 = vmatpush.bf16.msra.mxu2 %v1177_v33 }
 0x558   : > { %v1995_v50 = vpop.eup %1994 }
 0x559   : > { %v1235_v48 = vpop.xlane.xlu0 %1234  ;;  %v1169_v52 = vmul.f32 %v1995_v50, %v2374_v8 }
 0x55b   : > { %v1170_v54 = vpack.c.bf16 %v1169_v52, %v1169_v52 }
 0x561   : > { %v1303_v55 = vpop.xlane.xlu1 %1302 }
 0x562   : > { %1996 = vrcp.f32 %v1303_v55 }
 0x565   : > { %1820 = vmatmul.msk.bf16.vlgmr.msrb.gmra.mxu2 %vm800_vm10, %v1037_v47 }
 0x568   : > { %v1997_v57 = vpop.eup %1996 }
 0x569   : > { %v1305_v59 = vmul.f32 %v1997_v57, %v1985_v21 }
 0x56b   : > { %v1306_v31 = vpack.c.bf16 %v1305_v59, %v1305_v59 }
 0x56c   : > { %v1308_v49 = vpop.permute.xlu0 %1307 }
 0x56d   : > { %v1313_v51 = vsel %vm839_vm11, %v1308_v49, 0 }
 0x56e   : > { %1322 = vmatpush.bf16.msrb.mxu2 %v1313_v51 }
 0x575   : > { %v986_v56 = vpop.f32.mrf.mxu1  ;;  %1824 = vmatmul.msk.bf16.vlgmr.msra.gmra.mxu2 %vm800_vm10, %v1170_v54  ;;  %v1899_v54 = vld [vmem:[%s2222_s4 + $0x8] sm:$0xff] }
 0x576   : > { %v990_v4 = vpack.c.bf16 %v986_v56, %v986_v56 }
 0x57d   : > { %v988_v58 = vpop.f32.mrf.mxu1 }
 0x57e   : > { %v1898_v58 = vld [vmem:[%s2222_s4] sm:$0xff] }
 0x585   : > { %1828 = vmatmul.msk.bf16.vlgmr.msrb.gmra.mxu2 %vm800_vm10, %v1306_v31 }
 0x58a   : > { %v1102_v60 = vpop.xlane.xlu2 %1101 }
 0x58b   : > { %1998 = vrcp.f32 %v1102_v60 }
 0x58c   : > { %2000 = vrcp.f32 %v1235_v48 }
 0x591   : > { %v1999_v61 = vpop.eup %1998 }
 0x592   : > { %v1104_v62 = vmul.f32 %v1999_v61, %v1989_v36  ;;  %v1240_v63 = vpop.permute.xlu2 %1239  ;;  %v2001_v53 = vpop.eup %2000 }
 0x593   : > { %v1245_v13 = vsel %vm839_vm11, %v1240_v63, 0  ;;  %v1237_v0 = vmul.f32 %v2001_v53, %v2378_v12 }
 0x594   : > { %v1105_v6 = vpack.c.bf16 %v1104_v62, %v1104_v62  ;;  %1254 = vmatpush.bf16.msrb.mxu1 %v1245_v13 }
 0x595   : > { %v1238_v1 = vpack.c.bf16 %v1237_v0, %v1237_v0 }
 0x596   : > { %1822 = vmatmul.msk.bf16.vlgmr.msra.gmra.mxu1 %vm800_vm10, %v1105_v6 }
 0x598   : > { %1466 = vmatpush.bf16.msra.mxu1 %v1899_v54 }
 0x59c   : > { %1467 = vmatpush.bf16.msra.mxu1 %v1898_v58 }
 0x5a6   : > { %1826 = vmatmul.msk.bf16.vlgmr.msrb.gmra.mxu1 %vm800_vm10, %v1238_v1 }
 0x5d8   : > { %v917_v17 = vpop.f32.mrf.mxu2 }
 0x5d9   : > { %v921_v2 = vpack.c.bf16 %v917_v17, %v917_v17 }
 0x5db   : > { %923 = vrot.lane.b32.xlu0 %v921_v2, %s2083_s19 }
 0x5e0   : > { %v919_v3 = vpop.f32.mrf.mxu2 }
 0x5e3   : > { %992 = vrot.lane.b32.xlu0 %v990_v4, %s2084_s25 }
 0x5e8   : > { %v1055_v8 = vpop.f32.mrf.mxu2 }
 0x5e9   : > { %v1059_v9 = vpack.c.bf16 %v1055_v8, %v1055_v8 }
 0x5eb   : > { %1061 = vrot.lane.b32.xlu0 %v1059_v9, %s2085_s20 }
 0x5f0   : > { %v1057_v11 = vpop.f32.mrf.mxu2 }
 0x5f8   : > { %v1188_v14 = vpop.f32.mrf.mxu2 }
 0x5f9   : > { %v1192_v16 = vpack.c.bf16 %v1188_v14, %v1188_v14  ;;  %v1961_v14 = vld [vmem:[%s648_s28] ss:$0 sm:$0xff] }
 0x5fb   : > { %1194 = vrot.lane.b32.xlu1 %v1192_v16, %s2083_s19 }
 0x600   : > { %v1190_v12 = vpop.f32.mrf.mxu2 }
 0x608   : > { %v1324_v18 = vpop.f32.mrf.mxu2 }
 0x609   : > { %v1328_v27 = vpack.c.bf16 %v1324_v18, %v1324_v18 }
 0x610   : > { %v1326_v20 = vpop.f32.mrf.mxu2 }
 0x613   : > { %v1123_v21 = vpop.f32.mrf.mxu1 }
 0x614   : > { %v1127_v22 = vpack.c.bf16 %v1123_v21, %v1123_v21 }
 0x616   : > { %1129 = vst.msk [vmem:[#allocation3 + $0x4] sm:$0xf] %vm857_vm13, %v1127_v22 }
 0x61b   : > { %v1125_v23 = vpop.f32.mrf.mxu1 }
 0x61c   : > { %v1907_v23 = vld [vmem:[%s2232_s22 + $0x38] sm:$0xff] }
 0x61d   : > { %1585 = vmatpush.bf16.msrb.mxu3 %v1907_v23 }
 0x623   : > { %v1256_v24 = vpop.f32.mrf.mxu1 }
 0x624   : > { %v1260_v25 = vpack.c.bf16 %v1256_v24, %v1256_v24  ;;  %v1906_v24 = vld [vmem:[%s2232_s22 + $0x30] sm:$0xff] }
 0x625   : > { %1586 = vmatpush.bf16.msrb.mxu3 %v1906_v24 }
 0x626   : > { %1262 = vrot.lane.b32.xlu2 %v1260_v25, %s2084_s25  ;;  %v1905_v25 = vld [vmem:[%s2232_s22 + $0x28] sm:$0xff] }
 0x629   : > { %1587 = vmatpush.bf16.msrb.mxu3 %v1905_v25 }
 0x62b   : > { %v1258_v26 = vpop.f32.mrf.mxu1 }
 0x62c   : > { %v1904_v26 = vld [vmem:[%s2232_s22 + $0x20] sm:$0xff] }
 0x62d   : > { %1588 = vmatpush.bf16.msrb.mxu3 %v1904_v26 }
 0x62e   : > { %1330 = vrot.lane.b32.xlu2 %v1328_v27, %s2085_s20  ;;  %v1962_v27 = vld [vmem:[%s656_s6] ss:$0 sm:$0xff]  ;;  %s2520_s6 = sld [smem:[#allocation8_spill]] }
 0x634   : > { %s2522_s14 = sadd.s32 4294967295, %s2520_s6  }
 0x635   : > { %p1912_p6 = scmp.eq.s32.totalorder %s2522_s14, 1 }
 0x64d   : > { %v924_v28 = vpop.permute.xlu0 %923 }
 0x64e   : > { %927 = vst.msk [vmem:[#allocation3] sm:$0xf] %vm926_vm14, %v924_v28  ;;  %v1903_v28 = vld [vmem:[%s2232_s22 + $0x18] sm:$0xff] }
 0x64f   : > { %1589 = vmatpush.bf16.msrb.mxu3 %v1903_v28 }
 0x653   : > { %1590 = vmatpush.bf16.msrb.mxu3 %v1902_v32 }
 0x655   : > { %v993_v29 = vpop.permute.xlu0 %992 }
 0x656   : > { %996 = vst.msk [vmem:[#allocation3] sm:$0xf] %vm995_vm15, %v993_v29 }
 0x65d   : > { %v1062_v30 = vpop.permute.xlu0 %1061 }
 0x65e   : > { %1065 = vst.msk [vmem:[#allocation3] sm:$0xf] %vm1064_vm0, %v1062_v30 }
 0x66d   : > { %v1195_v10 = vpop.permute.xlu1 %1194 }
 0x66e   : > { %1197 = vst.msk [vmem:[#allocation3 + $0x4] sm:$0xf] %vm926_vm14, %v1195_v10 }
 0x680   : > { %v1263_v35 = vpop.permute.xlu2 %1262 }
 0x681   : > { %1265 = vst.msk [vmem:[#allocation3 + $0x4] sm:$0xf] %vm995_vm15, %v1263_v35  ;;  %v1901_v35 = vld [vmem:[%s2232_s22 + $0x8] sm:$0xff] }
 0x682   : > { %1591 = vmatpush.bf16.msrb.mxu3 %v1901_v35 }
 0x688   : > { %v1331_v36 = vpop.permute.xlu2 %1330 }
 0x689   : > { %1333 = vst.msk [vmem:[#allocation3 + $0x4] sm:$0xf] %vm1064_vm0, %v1331_v36 }
 0x690   : > { %v1895_v38 = vld [vmem:[#allocation3] sm:$0xff] }
 0x691   : > { %1841 = vmatmul.msk.bf16.vlgmr.msra.gmra.mxu0 %vm689_vm1, %v1895_v38 }
 0x70e   : > { %v1373_v40 = vpop.f32.mrf.mxu0 }
 0x70f   : > { %v1374_v19 = vadd.f32 %v1959_v39, %v1373_v40 }
 0x711   : > { %v2418_v41 = vadd.f32 %v1374_v19, %v2247_v5 }
 0x713   : > { %v1382_v42 = vsel %vm689_vm1, %v2418_v41, 0.0 }
 0x714   : > { %1383 = vadd.xlane.f32.xlu0 %v1382_v42 }
 0x716   : > { %v1375_v43 = vpop.f32.mrf.mxu0 }
 0x717   : > { %v1376_v44 = vadd.f32 %v1959_v39, %v1375_v43  ;;  %v1900_v39 = vld [vmem:[%s2232_s22] sm:$0xff] }
 0x718   : > { %1592 = vmatpush.bf16.msrb.mxu3 %v1900_v39 }
 0x719   : > { %v2423_v33 = vadd.f32 %v1376_v44, %v2251_v7 }
 0x71b   : > { %v1385_v45 = vsel %vm689_vm1, %v2423_v33, 0.0 }
 0x71c   : > { %1386 = vadd.xlane.f32.xlu2 %v1385_v45 }
 0x787   : > { %v1384_v46 = vpop.xlane.xlu0 %1383 }
 0x788   : > { %v1388_v37 = vmul.f32 %v1384_v46, %v2255_v15 }
 0x78a   : > { %v1390_v5 = vsub.f32 %v2418_v41, %v1388_v37 }
 0x78c   : > { %v1392_v47 = vmul.f32 %v1390_v5, %v1390_v5 }
 0x78e   : > { %v1394_v48 = vsel %vm689_vm1, %v1392_v47, 0.0 }
 0x78f   : > { %v1387_v49 = vpop.xlane.xlu2 %1386  ;;  %1395 = vadd.xlane.f32.xlu1 %v1394_v48 }
 0x790   : > { %v1389_v50 = vmul.f32 %v1387_v49, %v2255_v15 }
 0x792   : > { %v1391_v7 = vsub.f32 %v2423_v33, %v1389_v50 }
 0x794   : > { %v1393_v51 = vmul.f32 %v1391_v7, %v1391_v7 }
 0x796   : > { %v1397_v52 = vsel %vm689_vm1, %v1393_v51, 0.0 }
 0x797   : > { %1398 = vadd.xlane.f32.xlu0 %v1397_v52 }
 0x802   : > { %v1396_v55 = vpop.xlane.xlu1 %1395 }
 0x803   : > { %v1400_v56 = vmul.f32 %v1396_v55, %v2255_v15 }
 0x805   : > { %v1402_v57 = vadd.f32 1e-05, %v1400_v56 }
 0x807   : > { %2002 = vrsqrt.f32 %v1402_v57  ;;  %vm1410_vm3 = vweird.f32 %v1402_v57 }
 0x80a   : > { %v1399_v59 = vpop.xlane.xlu0 %1398 }
 0x80b   : > { %v1401_v31 = vmul.f32 %v1399_v59, %v2255_v15  ;;  %v1960_v15 = vld [vmem:[%s645_s3] ss:$0 sm:$0xff] }
 0x80d   : > { %v2003_v60 = vpop.eup %2002  ;;  %v1403_v61 = vadd.f32 1e-05, %v1401_v31 }
 0x80e   : > { %v1405_v62 = vmul.f32 %v2003_v60, %v1402_v57  ;;  %vm1411_vm2 = vweird.f32 %v2003_v60 }
 0x80f   : > { %2004 = vrsqrt.f32 %v1403_v61  ;;  %vm1412_vm4 = vmor %vm1410_vm3, %vm1411_vm2  ;;  %vm1420_vm6 = vweird.f32 %v1403_v61 }
 0x810   : > { %v1406_v63 = vmul.f32 %v2003_v60, %v1405_v62 }
 0x812   : > { %v1407_v13 = vmul.f32 0.5, %v1406_v63 }
 0x814   : > { %v1408_v6 = vsub.f32 1.5, %v1407_v13 }
 0x815   : > { %v2005_v53 = vpop.eup %2004 }
 0x816   : > { %v1409_v0 = vmul.f32 %v2003_v60, %v1408_v6  ;;  %v1415_v1 = vmul.f32 %v2005_v53, %v1403_v61  ;;  %vm1421_vm5 = vweird.f32 %v2005_v53 }
 0x817   : > { %vm1422_vm7 = vmor %vm1420_vm6, %vm1421_vm5 }
 0x818   : > { %v1416_v17 = vmul.f32 %v2005_v53, %v1415_v1  ;;  %v1413_v2 = vsel %vm1412_vm4, %v2003_v60, %v1409_v0 }
 0x819   : > { %v1424_v8 = vmul.f32 %v1413_v2, %v1390_v5 }
 0x81a   : > { %v1417_v3 = vmul.f32 0.5, %v1416_v17 }
 0x81b   : > { %v1429_v16 = vmul.f32 %v1960_v15, %v1424_v8 }
 0x81c   : > { %v1418_v4 = vsub.f32 1.5, %v1417_v3 }
 0x81d   : > { %v1434_v20 = vadd.f32 %v1961_v14, %v1429_v16 }
 0x81e   : > { %v1419_v9 = vmul.f32 %v2005_v53, %v1418_v4 }
 0x820   : > { %v1423_v11 = vsel %vm1422_vm7, %v2005_v53, %v1419_v9  ;;  %v1963_v53 = vld [vmem:[%s664_s26] ss:$0 sm:$0xff] }
 0x821   : > { %v1425_v12 = vmul.f32 %v1423_v11, %v1391_v7 }
 0x823   : > { %v1430_v18 = vmul.f32 %v1960_v15, %v1425_v12 }
 0x825   : > { %v1435_v21 = vadd.f32 %v1961_v14, %v1430_v18 }
 0x827   : > { %v1436_v22 = vpack.c.bf16 %v1435_v21, %v1434_v20 }
 0x829   : > { %1850 = vmatmul.msk.bf16.vlgmr.msra.gmra.mxu1 %vm689_vm1, %v1436_v22 }
 0x8a6   : > { %v1469_v29 = vpop.f32.mrf.mxu1 }
 0x8a7   : > { %v1470_v30 = vadd.f32 %v1962_v27, %v1469_v29 }
 0x8a9   : > { %v1851_v34 = vmul.f32 -1.702, %v1470_v30 }
 0x8ab   : > { %v1478_v10 = vmul.f32 1.442695, %v1851_v34 }
 0x8ad   : > { %2006 = vpow2.f32 %v1478_v10 }
 0x8ae   : > { %v1471_v36 = vpop.f32.mrf.mxu1 }
 0x8af   : > { %v1472_v38 = vadd.f32 %v1962_v27, %v1471_v36 }
 0x8b1   : > { %v1852_v40 = vmul.f32 -1.702, %v1472_v38 }
 0x8b3   : > { %v2007_v19 = vpop.eup %2006  ;;  %v1480_v42 = vmul.f32 1.442695, %v1852_v40 }
 0x8b4   : > { %v1482_v43 = vadd.f32 1.0, %v2007_v19 }
 0x8b5   : > { %2008 = vpow2.f32 %v1480_v42 }
 0x8b6   : > { %2010 = vrcp.f32 %v1482_v43  ;;  %v1495_v7 = vand.u32 2147483648, %v1482_v43  ;;  %vm1489_vm9 = vweird.f32 %v1482_v43  ;;  %v1493_v51 = vand.u32 2147483647, %v1482_v43 }
 0x8b8   : > { %v1496_v58 = vor.u32 1.1754944e-38, %v1495_v7  ;;  %vm1494_vm12 = vcmp.eq.f32.partialorder %v1493_v51, 8.507059e+37 }
 0x8bb   : > { %v2009_v44 = vpop.eup %2008 }
 0x8bc   : > { %v2011_v45 = vpop.eup %2010  ;;  %v1483_v46 = vadd.f32 1.0, %v2009_v44 }
 0x8bd   : > { %v1485_v37 = vmul.f32 %v2011_v45, %v1482_v43  ;;  %vm1490_vm8 = vweird.f32 %v2011_v45 }
 0x8be   : > { %2012 = vrcp.f32 %v1483_v46  ;;  %vm1491_vm10 = vmor %vm1489_vm9, %vm1490_vm8  ;;  %v1510_v54 = vand.u32 2147483648, %v1483_v46  ;;  %v1508_v57 = vand.u32 2147483647, %v1483_v46  ;;  %vm1504_vm13 = vweird.f32 %v1483_v46 }
 0x8bf   : > { %v1486_v5 = vsub.f32 1.0, %v1485_v37 }
 0x8c0   : > { %v1511_v60 = vor.u32 1.1754944e-38, %v1510_v54  ;;  %vm1509_vm15 = vcmp.eq.f32.partialorder %v1508_v57, 8.507059e+37 }
 0x8c1   : > { %v1487_v47 = vmul.f32 %v2011_v45, %v1486_v5 }
 0x8c3   : > { %v1488_v49 = vadd.f32 %v2011_v45, %v1487_v47 }
 0x8c4   : > { %v2013_v48 = vpop.eup %2012 }
 0x8c5   : > { %v1500_v50 = vmul.f32 %v2013_v48, %v1483_v46  ;;  %v1492_v55 = vsel %vm1491_vm10, %v2011_v45, %v1488_v49  ;;  %vm1505_vm11 = vweird.f32 %v2013_v48 }
 0x8c6   : > { %v1497_v31 = vsel %vm1494_vm12, %v1496_v58, %v1492_v55  ;;  %vm1506_vm14 = vmor %vm1504_vm13, %vm1505_vm11 }
 0x8c7   : > { %v1501_v52 = vsub.f32 1.0, %v1500_v50  ;;  %v1514_v63 = vmul.f32 %v1497_v31, %v1470_v30 }
 0x8c9   : > { %v1502_v56 = vmul.f32 %v2013_v48, %v1501_v52 }
 0x8cb   : > { %v1503_v59 = vadd.f32 %v2013_v48, %v1502_v56 }
 0x8cd   : > { %v1507_v61 = vsel %vm1506_vm14, %v2013_v48, %v1503_v59 }
 0x8ce   : > { %v1512_v62 = vsel %vm1509_vm15, %v1511_v60, %v1507_v61 }
 0x8cf   : > { %v1515_v13 = vmul.f32 %v1512_v62, %v1472_v38 }
 0x8d1   : > { %v1516_v6 = vpack.c.bf16 %v1515_v13, %v1514_v63 }
 0x8d3   : > { %1593 = vmatmul.bf16.vlgmr.msrb.gmra.mxu3 %v1516_v6 }
 0x956   : > { %v1594_v0 = vpop.f32.mrf.mxu3 }
 0x957   : > { %v1595_v1 = vadd.f32 %v1963_v53, %v1594_v0 }
 0x959   : > { %v1599_v17 = vadd.f32 %v1595_v1, %v2418_v41 }
 0x95b   : > { %1601 = vst.msk [vmem:[#allocation4] sm:$0xff] %vm689_vm1, %v1599_v17 }
 0x95e   : > { %v1596_v2 = vpop.f32.mrf.mxu3 }
 0x95f   : > { %v1597_v3 = vadd.f32 %v1963_v53, %v1596_v2 }
 0x961   : > { %v1600_v4 = vadd.f32 %v1597_v3, %v2423_v33 }
 0x963   : > { %1602 = vst.msk [vmem:[#allocation4 + $0x8] sm:$0xff] %vm689_vm1, %v1600_v4 }
 0x964   : > { %1909 = dma.vmem_to_hbm [thread:$0]  (%p1912_p6), %s1612_s27, 256, %s1614_s17, [#allocation5], %s2087_s18, %s2087_s18, %s2083_s19  }
 0x965   : > { %2055 = dma.done.wait (%p1912_p6), [#allocation5], 256  }
 0x966   : > { %2057 = vsyncadd (%p1912_p6), [#allocation5], 4294967040 }
 0x967 PF: > { %s2523_s26 = sld [smem:[#allocation8_spill]] }
 0x968   : > { %s2524_s29 = sld [smem:[#allocation7_spill]] }
 0x969   : > { %s2525_s30 = sld [smem:[#allocation9_spill]] }
 0x96d   : > { %s25_s15 = sadd.s32 1, %s2523_s26  }
 0x96e   : > { %p22_p7 = scmp.ge.s32.totalorder %s25_s15, 4  }
 0x970   :  { %24 = sbr.rel (!%p22_p7) target bundleno = 7 (0x7), region = 146 }
 0x975   :  { %1630 = vsyncpa [#allocation5], 1 }
 0x976   :  { %1632 = vsyncpa [#allocation5 + $0x1], 1 }

</bundles_post_ra>
